<compile_context>
chip_gen: v7x
topology: tpu7x:2x2x1
jax: 0.10.0
libtpu: 0.0.40
codegen_flags: <defaults>
</compile_context>

<pallas_src>
import jax
import jax.numpy as jnp
from jax import lax
from jax.experimental import pallas as pl
from jax.experimental.pallas import tpu as pltpu

N_HEADS = 3
D_K = 64
D_V = 64
LN_EPS = 1e-5


def multi_attn_kernel(x_ref, wqkv_ref, bqkv_ref, wo_ref, bo_ref,
                      gamma_ref, beta_ref, out_ref, ocat_ref):
    """All layers + whole batch chunk fused; grid = (batch_chunks,)."""
    bt, s, d = x_ref.shape
    n_layers = wqkv_ref.shape[0]
    mxu_dtype = wqkv_ref.dtype                 # MXU operand dtype (f32 or bf16)
    scale = 1.0 / jnp.sqrt(jnp.float32(D_K))
    q_off, k_off, v_off = 0, N_HEADS * D_K, 2 * N_HEADS * D_K

    # Activation carry is a value (f32) — residual / LayerNorm math stays f32.
    act = x_ref[...].reshape(bt * s, d).astype(jnp.float32)

    # Layer loop: statically unrolled (L is small and all weights are VMEM-resident).
    # TODO(synk): for large L switch to lax.fori_loop / a streamed layer grid axis.
    for l in range(n_layers):
        # Fused QKV projection: single (Bt*S, D) x (D, 576) matmul, f32 accumulate.
        qkv = jnp.dot(act.astype(mxu_dtype), wqkv_ref[l],
                      preferred_element_type=jnp.float32) + bqkv_ref[l]

        # Per-(batch, head) scaled dot-product attention on tiny (S, S) tiles;
        # head outputs written at static offsets into the VMEM concat buffer.
        for b in range(bt):
            r0 = b * s
            for h in range(N_HEADS):
                q = qkv[r0:r0 + s, q_off + h * D_K: q_off + (h + 1) * D_K]
                k = qkv[r0:r0 + s, k_off + h * D_K: k_off + (h + 1) * D_K]
                v = qkv[r0:r0 + s, v_off + h * D_V: v_off + (h + 1) * D_V]
                # Contract last dims directly -> no explicit k.T (no XLU transpose).
                scores = lax.dot_general(
                    q.astype(mxu_dtype), k.astype(mxu_dtype),
                    (((1,), (1,)), ((), ())),
                    preferred_element_type=jnp.float32) * scale
                # TODO(synk): input_mask is None in this eval path; masked_fill omitted.
                m = jnp.max(scores, axis=-1, keepdims=True)
                p = jnp.exp(scores - m)
                attn = p / jnp.sum(p, axis=-1, keepdims=True)   # exact divide
                o_h = jnp.dot(attn.astype(mxu_dtype), v.astype(mxu_dtype),
                              preferred_element_type=jnp.float32)
                ocat_ref[r0:r0 + s, h * D_V:(h + 1) * D_V] = o_h.astype(ocat_ref.dtype)

        # Single full-width output projection (Bt*S, 192) x (192, D).
        proj = jnp.dot(ocat_ref[...], wo_ref[l], preferred_element_type=jnp.float32)

        # TODO(synk): dropout (rate 0.1) is identity in eval mode; not applied.
        y = proj + bo_ref[l] + act                              # residual add (f32)
        mean = jnp.mean(y, axis=-1, keepdims=True)
        var = jnp.mean((y - mean) ** 2, axis=-1, keepdims=True)
        act = (y - mean) * lax.rsqrt(var + LN_EPS) * gamma_ref[l] + beta_ref[l]

    # One HBM writeback per batch chunk.
    out_ref[...] = act.reshape(bt, s, d).astype(out_ref.dtype)


def multi_attn(x, params, input_mask=None, *,
               mxu_dtype=jnp.bfloat16, batch_chunks=1):
    """MultiAttn.forward: all layers and the whole batch in a single pallas_call.

    mxu_dtype:     operand dtype for MXU matmuls. bf16 = full-rate MXU on v6e/v7x
                   and half the weight DMA bytes; f32 = exact reference parity.
                   Accumulation, residual and LayerNorm stay f32 either way.
    batch_chunks:  number of (parallel) grid steps the batch is split into.
                   1 folds the batch fully (v5e/v6e, single TensorCore);
                   2 lets v7x's two TensorCores split the work.
    """
    del input_mask  # TODO(synk): None in this eval path; masked_fill not implemented.
    B, S, D = x.shape
    wqkv, bqkv, wo, bo, gamma, beta = params
    assert B % batch_chunks == 0
    bt = B // batch_chunks

    # Matmul weights carried in the MXU operand dtype; biases / LN params stay f32
    # (keeps all VPU elementwise math f32 — required on v5e, harmless elsewhere).
    wqkv = wqkv.astype(mxu_dtype)
    wo = wo.astype(mxu_dtype)

    def resident(a):  # full L-stacked slab, VMEM-resident across every grid step
        nd = a.ndim
        return pl.BlockSpec(a.shape, lambda c, nd=nd: (0,) * nd)

    return pl.pallas_call(
        multi_attn_kernel,
        out_shape=jax.ShapeDtypeStruct((B, S, D), x.dtype),
        grid=(batch_chunks,),
        in_specs=[pl.BlockSpec((bt, S, D), lambda c: (c, 0, 0)),
                  resident(wqkv), resident(bqkv), resident(wo),
                  resident(bo), resident(gamma), resident(beta)],
        out_specs=pl.BlockSpec((bt, S, D), lambda c: (c, 0, 0)),
        scratch_shapes=[pltpu.VMEM((bt * S, N_HEADS * D_V), mxu_dtype)],
        compiler_params=pltpu.CompilerParams(
            dimension_semantics=("parallel",)),
        # NOTE: at these sizes everything fits the default scoped VMEM; when scaling
        # S/D/L, set vmem_limit_bytes explicitly (v7x physical ceiling is 64 MiB).
    )(x, wqkv, bqkv, wo, bo, gamma, beta)


def init_params(key, hidden_dim, layer_num):
    d = hidden_dim
    per_layer = []
    for _ in range(layer_num):
        keys = jax.random.split(key, 9)
        key = keys[0]

        def lin(k, fan_in, fan_out):
            return (jax.random.normal(k, (fan_in, fan_out), jnp.float32)
                    * (1.0 / jnp.sqrt(jnp.float32(fan_in))))

        wq = lin(keys[1], d, N_HEADS * D_K)
        bq = jax.random.normal(keys[2], (1, N_HEADS * D_K), jnp.float32) * 0.02
        wk = lin(keys[3], d, N_HEADS * D_K)
        bk = jax.random.normal(keys[4], (1, N_HEADS * D_K), jnp.float32) * 0.02
        wv = lin(keys[5], d, N_HEADS * D_V)
        bv = jax.random.normal(keys[6], (1, N_HEADS * D_V), jnp.float32) * 0.02
        wo = lin(keys[7], N_HEADS * D_V, d)
        bo = jax.random.normal(keys[8], (1, d), jnp.float32) * 0.02
        gamma = jnp.ones((1, d), jnp.float32)
        beta = jnp.zeros((1, d), jnp.float32)
        # Pre-fuse the QKV projections: zero runtime cost, one MXU push in-kernel.
        wqkv = jnp.concatenate([wq, wk, wv], axis=-1)      # (D, 576)
        bqkv = jnp.concatenate([bq, bk, bv], axis=-1)      # (1, 576)
        per_layer.append((wqkv, bqkv, wo, bo, gamma, beta))
    # Stack each tensor with a leading layer axis -> one fused pallas_call.
    return tuple(jnp.stack(ts, axis=0) for ts in zip(*per_layer))


def multi_attn_ref(x, params):
    """Pure-JAX f32 reference for correctness checking."""
    wqkv, bqkv, wo, bo, gamma, beta = params
    L = wqkv.shape[0]
    for i in range(L):
        B, S, D = x.shape
        qkv = x @ wqkv[i] + bqkv[i]
        q, k, v = jnp.split(qkv, 3, axis=-1)
        q = q.reshape(B, S, N_HEADS, D_K).transpose(0, 2, 1, 3)
        k = k.reshape(B, S, N_HEADS, D_K).transpose(0, 2, 1, 3)
        v = v.reshape(B, S, N_HEADS, D_V).transpose(0, 2, 1, 3)
        scores = jnp.einsum("bhqd,bhkd->bhqk", q, k) / jnp.sqrt(jnp.float32(D_K))
        attn = jax.nn.softmax(scores, axis=-1)
        o = jnp.einsum("bhqk,bhkd->bhqd", attn, v)
        o = o.transpose(0, 2, 1, 3).reshape(B, S, N_HEADS * D_V)
        y = o @ wo[i] + bo[i] + x
        mean = jnp.mean(y, axis=-1, keepdims=True)
        var = jnp.mean((y - mean) ** 2, axis=-1, keepdims=True)
        x = (y - mean) / jnp.sqrt(var + LN_EPS) * gamma[i] + beta[i]
    return x


if __name__ == "__main__":
    B, S, hidden_dim, layer_num = 2, 8, 32, 2

    key = jax.random.PRNGKey(0)
    k_x, k_p = jax.random.split(key)
    x = jax.random.normal(k_x, (B, S, hidden_dim), jnp.float32)
    params = init_params(k_p, hidden_dim, layer_num)

    with jax.default_matmul_precision("highest"):
        ref = multi_attn_ref(x, params)

    # f32 MXU operands, batch fully folded (v5e/v6e path): tight parity.
    out_f32 = jax.block_until_ready(
        multi_attn(x, params, mxu_dtype=jnp.float32, batch_chunks=1))
    assert out_f32.shape == (B, S, hidden_dim)
    assert jnp.allclose(out_f32, ref, rtol=2e-4, atol=2e-4), "f32 mismatch vs reference"

    # bf16 MXU operands + 2-way parallel batch chunks (v6e/v7x fast path):
    # loose sanity bound (bf16 operand rounding, ~1e-2 relative over 2 layers).
    out_bf16 = jax.block_until_ready(
        multi_attn(x, params, mxu_dtype=jnp.bfloat16, batch_chunks=2))
    assert out_bf16.shape == (B, S, hidden_dim)
    assert jnp.allclose(out_bf16, ref, rtol=1e-1, atol=1e-1), "bf16 sanity check failed"

    print("KERNEL_OK")
</pallas_src>

<mosaic_0001>
module attributes {stable_mosaic.version = 11 : i64} {
  func.func @multi_attn_kernel(%arg0: i32, %arg1: memref<2x8x32xf32, #tpu.memory_space<vmem>>, %arg2: memref<2x32x576xf32, #tpu.memory_space<vmem>>, %arg3: memref<2x1x576xf32, #tpu.memory_space<vmem>>, %arg4: memref<2x192x32xf32, #tpu.memory_space<vmem>>, %arg5: memref<2x1x32xf32, #tpu.memory_space<vmem>>, %arg6: memref<2x1x32xf32, #tpu.memory_space<vmem>>, %arg7: memref<2x1x32xf32, #tpu.memory_space<vmem>>, %arg8: memref<2x8x32xf32, #tpu.memory_space<vmem>>, %arg9: memref<16x192xf32, #tpu.memory_space<vmem>>) attributes {dimension_semantics = [#tpu.dimension_semantics<parallel>], iteration_bounds = array<i64: 1>, scalar_prefetch = 0 : i64, scratch_operands = 1 : i64, tpu.core_type = #tpu.core_type<tc>, window_params = [{transform_indices = @transform_0, window_bounds = array<i64: 2, 8, 32>}, {pipeline_mode = #tpu.pipeline_mode<synchronous>, transform_indices = @transform_1, window_bounds = array<i64: 2, 32, 576>}, {pipeline_mode = #tpu.pipeline_mode<synchronous>, transform_indices = @transform_2, window_bounds = array<i64: 2, 1, 576>}, {pipeline_mode = #tpu.pipeline_mode<synchronous>, transform_indices = @transform_3, window_bounds = array<i64: 2, 192, 32>}, {pipeline_mode = #tpu.pipeline_mode<synchronous>, transform_indices = @transform_4, window_bounds = array<i64: 2, 1, 32>}, {pipeline_mode = #tpu.pipeline_mode<synchronous>, transform_indices = @transform_5, window_bounds = array<i64: 2, 1, 32>}, {pipeline_mode = #tpu.pipeline_mode<synchronous>, transform_indices = @transform_6, window_bounds = array<i64: 2, 1, 32>}, {transform_indices = @transform_7, window_bounds = array<i64: 2, 8, 32>}]} {
    %cst = arith.constant 6.400000e+01 : f32
    %0 = math.sqrt %cst : f32
    %cst_0 = arith.constant 1.000000e+00 : f32
    %1 = arith.divf %cst_0, %0 : f32
    %c0 = arith.constant 0 : index
    %c0_1 = arith.constant 0 : index
    %c0_2 = arith.constant 0 : index
    %2 = vector.load %arg1[%c0, %c0_1, %c0_2] : memref<2x8x32xf32, #tpu.memory_space<vmem>>, vector<2x8x32xf32>
    %3 = vector.shape_cast %2 : vector<2x8x32xf32> to vector<16x32xf32>
    %c0_3 = arith.constant 0 : index
    %c0_4 = arith.constant 0 : index
    %c0_5 = arith.constant 0 : index
    %4 = vector.load %arg2[%c0_3, %c0_4, %c0_5] : memref<2x32x576xf32, #tpu.memory_space<vmem>>, vector<1x32x576xf32>
    %5 = vector.shape_cast %4 : vector<1x32x576xf32> to vector<32x576xf32>
    %cst_6 = arith.constant dense<0.000000e+00> : vector<16x576xf32>
    %6 = tpu.matmul %3, %5, %cst_6 {dimension_numbers = #tpu.dot_dimension_numbers<[1], [0], [0], [1], [0, 0, 1, 1], [], []>} : vector<16x32xf32>, vector<32x576xf32>, vector<16x576xf32> -> vector<16x576xf32>
    %c0_7 = arith.constant 0 : index
    %c0_8 = arith.constant 0 : index
    %c0_9 = arith.constant 0 : index
    %7 = vector.load %arg3[%c0_7, %c0_8, %c0_9] : memref<2x1x576xf32, #tpu.memory_space<vmem>>, vector<1x1x576xf32>
    %8 = vector.shape_cast %7 : vector<1x1x576xf32> to vector<1x576xf32>
    %9 = vector.broadcast %8 : vector<1x576xf32> to vector<16x576xf32>
    %10 = arith.addf %6, %9 : vector<16x576xf32>
    %11 = vector.extract_strided_slice %10 {offsets = [0, 0], sizes = [8, 64], strides = [1, 1]} : vector<16x576xf32> to vector<8x64xf32>
    %12 = vector.extract_strided_slice %10 {offsets = [0, 192], sizes = [8, 64], strides = [1, 1]} : vector<16x576xf32> to vector<8x64xf32>
    %13 = vector.extract_strided_slice %10 {offsets = [0, 384], sizes = [8, 64], strides = [1, 1]} : vector<16x576xf32> to vector<8x64xf32>
    %cst_10 = arith.constant dense<0.000000e+00> : vector<8x8xf32>
    %14 = tpu.matmul %11, %12, %cst_10 {dimension_numbers = #tpu.dot_dimension_numbers<[1], [1], [0], [0], [0, 0, 1, 0], [], []>} : vector<8x64xf32>, vector<8x64xf32>, vector<8x8xf32> -> vector<8x8xf32>
    %15 = vector.broadcast %1 : f32 to vector<8x8xf32>
    %16 = arith.mulf %14, %15 : vector<8x8xf32>
    %cst_11 = arith.constant dense<0xFF800000> : vector<8xf32>
    %17 = vector.multi_reduction <maximumf>, %16, %cst_11 [1] : vector<8x8xf32> to vector<8xf32>
    %18 = vector.shape_cast %17 : vector<8xf32> to vector<8x1xf32>
    %19 = vector.broadcast %18 : vector<8x1xf32> to vector<8x8xf32>
    %20 = arith.subf %16, %19 : vector<8x8xf32>
    %21 = math.exp %20 : vector<8x8xf32>
    %cst_12 = arith.constant dense<0.000000e+00> : vector<8xf32>
    %22 = vector.multi_reduction <add>, %21, %cst_12 [1] : vector<8x8xf32> to vector<8xf32>
    %23 = vector.shape_cast %22 : vector<8xf32> to vector<8x1xf32>
    %24 = vector.broadcast %23 : vector<8x1xf32> to vector<8x8xf32>
    %25 = arith.divf %21, %24 : vector<8x8xf32>
    %cst_13 = arith.constant dense<0.000000e+00> : vector<8x64xf32>
    %26 = tpu.matmul %25, %13, %cst_13 {dimension_numbers = #tpu.dot_dimension_numbers<[1], [0], [0], [1], [0, 0, 1, 1], [], []>} : vector<8x8xf32>, vector<8x64xf32>, vector<8x64xf32> -> vector<8x64xf32>
    %c0_14 = arith.constant 0 : index
    %c0_15 = arith.constant 0 : index
    %27 = vector.load %arg9[%c0_14, %c0_15] : memref<16x192xf32, #tpu.memory_space<vmem>>, vector<8x64xf32>
    tpu.vector_store %arg9[%c0_14, %c0_15], %26 {strides = array<i32>} : memref<16x192xf32, #tpu.memory_space<vmem>>, vector<8x64xf32>,
    %28 = vector.extract_strided_slice %10 {offsets = [0, 64], sizes = [8, 64], strides = [1, 1]} : vector<16x576xf32> to vector<8x64xf32>
    %29 = vector.extract_strided_slice %10 {offsets = [0, 256], sizes = [8, 64], strides = [1, 1]} : vector<16x576xf32> to vector<8x64xf32>
    %30 = vector.extract_strided_slice %10 {offsets = [0, 448], sizes = [8, 64], strides = [1, 1]} : vector<16x576xf32> to vector<8x64xf32>
    %cst_16 = arith.constant dense<0.000000e+00> : vector<8x8xf32>
    %31 = tpu.matmul %28, %29, %cst_16 {dimension_numbers = #tpu.dot_dimension_numbers<[1], [1], [0], [0], [0, 0, 1, 0], [], []>} : vector<8x64xf32>, vector<8x64xf32>, vector<8x8xf32> -> vector<8x8xf32>
    %32 = vector.broadcast %1 : f32 to vector<8x8xf32>
    %33 = arith.mulf %31, %32 : vector<8x8xf32>
    %cst_17 = arith.constant dense<0xFF800000> : vector<8xf32>
    %34 = vector.multi_reduction <maximumf>, %33, %cst_17 [1] : vector<8x8xf32> to vector<8xf32>
    %35 = vector.shape_cast %34 : vector<8xf32> to vector<8x1xf32>
    %36 = vector.broadcast %35 : vector<8x1xf32> to vector<8x8xf32>
    %37 = arith.subf %33, %36 : vector<8x8xf32>
    %38 = math.exp %37 : vector<8x8xf32>
    %cst_18 = arith.constant dense<0.000000e+00> : vector<8xf32>
    %39 = vector.multi_reduction <add>, %38, %cst_18 [1] : vector<8x8xf32> to vector<8xf32>
    %40 = vector.shape_cast %39 : vector<8xf32> to vector<8x1xf32>
    %41 = vector.broadcast %40 : vector<8x1xf32> to vector<8x8xf32>
    %42 = arith.divf %38, %41 : vector<8x8xf32>
    %cst_19 = arith.constant dense<0.000000e+00> : vector<8x64xf32>
    %43 = tpu.matmul %42, %30, %cst_19 {dimension_numbers = #tpu.dot_dimension_numbers<[1], [0], [0], [1], [0, 0, 1, 1], [], []>} : vector<8x8xf32>, vector<8x64xf32>, vector<8x64xf32> -> vector<8x64xf32>
    %c0_20 = arith.constant 0 : index
    %c64 = arith.constant 64 : index
    %44 = vector.load %arg9[%c0_20, %c64] : memref<16x192xf32, #tpu.memory_space<vmem>>, vector<8x64xf32>
    tpu.vector_store %arg9[%c0_20, %c64], %43 {strides = array<i32>} : memref<16x192xf32, #tpu.memory_space<vmem>>, vector<8x64xf32>,
    %45 = vector.extract_strided_slice %10 {offsets = [0, 128], sizes = [8, 64], strides = [1, 1]} : vector<16x576xf32> to vector<8x64xf32>
    %46 = vector.extract_strided_slice %10 {offsets = [0, 320], sizes = [8, 64], strides = [1, 1]} : vector<16x576xf32> to vector<8x64xf32>
    %47 = vector.extract_strided_slice %10 {offsets = [0, 512], sizes = [8, 64], strides = [1, 1]} : vector<16x576xf32> to vector<8x64xf32>
    %cst_21 = arith.constant dense<0.000000e+00> : vector<8x8xf32>
    %48 = tpu.matmul %45, %46, %cst_21 {dimension_numbers = #tpu.dot_dimension_numbers<[1], [1], [0], [0], [0, 0, 1, 0], [], []>} : vector<8x64xf32>, vector<8x64xf32>, vector<8x8xf32> -> vector<8x8xf32>
    %49 = vector.broadcast %1 : f32 to vector<8x8xf32>
    %50 = arith.mulf %48, %49 : vector<8x8xf32>
    %cst_22 = arith.constant dense<0xFF800000> : vector<8xf32>
    %51 = vector.multi_reduction <maximumf>, %50, %cst_22 [1] : vector<8x8xf32> to vector<8xf32>
    %52 = vector.shape_cast %51 : vector<8xf32> to vector<8x1xf32>
    %53 = vector.broadcast %52 : vector<8x1xf32> to vector<8x8xf32>
    %54 = arith.subf %50, %53 : vector<8x8xf32>
    %55 = math.exp %54 : vector<8x8xf32>
    %cst_23 = arith.constant dense<0.000000e+00> : vector<8xf32>
    %56 = vector.multi_reduction <add>, %55, %cst_23 [1] : vector<8x8xf32> to vector<8xf32>
    %57 = vector.shape_cast %56 : vector<8xf32> to vector<8x1xf32>
    %58 = vector.broadcast %57 : vector<8x1xf32> to vector<8x8xf32>
    %59 = arith.divf %55, %58 : vector<8x8xf32>
    %cst_24 = arith.constant dense<0.000000e+00> : vector<8x64xf32>
    %60 = tpu.matmul %59, %47, %cst_24 {dimension_numbers = #tpu.dot_dimension_numbers<[1], [0], [0], [1], [0, 0, 1, 1], [], []>} : vector<8x8xf32>, vector<8x64xf32>, vector<8x64xf32> -> vector<8x64xf32>
    %c0_25 = arith.constant 0 : index
    %c128 = arith.constant 128 : index
    %61 = vector.load %arg9[%c0_25, %c128] : memref<16x192xf32, #tpu.memory_space<vmem>>, vector<8x64xf32>
    tpu.vector_store %arg9[%c0_25, %c128], %60 {strides = array<i32>} : memref<16x192xf32, #tpu.memory_space<vmem>>, vector<8x64xf32>,
    %62 = vector.extract_strided_slice %10 {offsets = [8, 0], sizes = [8, 64], strides = [1, 1]} : vector<16x576xf32> to vector<8x64xf32>
    %63 = vector.extract_strided_slice %10 {offsets = [8, 192], sizes = [8, 64], strides = [1, 1]} : vector<16x576xf32> to vector<8x64xf32>
    %64 = vector.extract_strided_slice %10 {offsets = [8, 384], sizes = [8, 64], strides = [1, 1]} : vector<16x576xf32> to vector<8x64xf32>
    %cst_26 = arith.constant dense<0.000000e+00> : vector<8x8xf32>
    %65 = tpu.matmul %62, %63, %cst_26 {dimension_numbers = #tpu.dot_dimension_numbers<[1], [1], [0], [0], [0, 0, 1, 0], [], []>} : vector<8x64xf32>, vector<8x64xf32>, vector<8x8xf32> -> vector<8x8xf32>
    %66 = vector.broadcast %1 : f32 to vector<8x8xf32>
    %67 = arith.mulf %65, %66 : vector<8x8xf32>
    %cst_27 = arith.constant dense<0xFF800000> : vector<8xf32>
    %68 = vector.multi_reduction <maximumf>, %67, %cst_27 [1] : vector<8x8xf32> to vector<8xf32>
    %69 = vector.shape_cast %68 : vector<8xf32> to vector<8x1xf32>
    %70 = vector.broadcast %69 : vector<8x1xf32> to vector<8x8xf32>
    %71 = arith.subf %67, %70 : vector<8x8xf32>
    %72 = math.exp %71 : vector<8x8xf32>
    %cst_28 = arith.constant dense<0.000000e+00> : vector<8xf32>
    %73 = vector.multi_reduction <add>, %72, %cst_28 [1] : vector<8x8xf32> to vector<8xf32>
    %74 = vector.shape_cast %73 : vector<8xf32> to vector<8x1xf32>
    %75 = vector.broadcast %74 : vector<8x1xf32> to vector<8x8xf32>
    %76 = arith.divf %72, %75 : vector<8x8xf32>
    %cst_29 = arith.constant dense<0.000000e+00> : vector<8x64xf32>
    %77 = tpu.matmul %76, %64, %cst_29 {dimension_numbers = #tpu.dot_dimension_numbers<[1], [0], [0], [1], [0, 0, 1, 1], [], []>} : vector<8x8xf32>, vector<8x64xf32>, vector<8x64xf32> -> vector<8x64xf32>
    %c8 = arith.constant 8 : index
    %c0_30 = arith.constant 0 : index
    %78 = vector.load %arg9[%c8, %c0_30] : memref<16x192xf32, #tpu.memory_space<vmem>>, vector<8x64xf32>
    tpu.vector_store %arg9[%c8, %c0_30], %77 {strides = array<i32>} : memref<16x192xf32, #tpu.memory_space<vmem>>, vector<8x64xf32>,
    %79 = vector.extract_strided_slice %10 {offsets = [8, 64], sizes = [8, 64], strides = [1, 1]} : vector<16x576xf32> to vector<8x64xf32>
    %80 = vector.extract_strided_slice %10 {offsets = [8, 256], sizes = [8, 64], strides = [1, 1]} : vector<16x576xf32> to vector<8x64xf32>
    %81 = vector.extract_strided_slice %10 {offsets = [8, 448], sizes = [8, 64], strides = [1, 1]} : vector<16x576xf32> to vector<8x64xf32>
    %cst_31 = arith.constant dense<0.000000e+00> : vector<8x8xf32>
    %82 = tpu.matmul %79, %80, %cst_31 {dimension_numbers = #tpu.dot_dimension_numbers<[1], [1], [0], [0], [0, 0, 1, 0], [], []>} : vector<8x64xf32>, vector<8x64xf32>, vector<8x8xf32> -> vector<8x8xf32>
    %83 = vector.broadcast %1 : f32 to vector<8x8xf32>
    %84 = arith.mulf %82, %83 : vector<8x8xf32>
    %cst_32 = arith.constant dense<0xFF800000> : vector<8xf32>
    %85 = vector.multi_reduction <maximumf>, %84, %cst_32 [1] : vector<8x8xf32> to vector<8xf32>
    %86 = vector.shape_cast %85 : vector<8xf32> to vector<8x1xf32>
    %87 = vector.broadcast %86 : vector<8x1xf32> to vector<8x8xf32>
    %88 = arith.subf %84, %87 : vector<8x8xf32>
    %89 = math.exp %88 : vector<8x8xf32>
    %cst_33 = arith.constant dense<0.000000e+00> : vector<8xf32>
    %90 = vector.multi_reduction <add>, %89, %cst_33 [1] : vector<8x8xf32> to vector<8xf32>
    %91 = vector.shape_cast %90 : vector<8xf32> to vector<8x1xf32>
    %92 = vector.broadcast %91 : vector<8x1xf32> to vector<8x8xf32>
    %93 = arith.divf %89, %92 : vector<8x8xf32>
    %cst_34 = arith.constant dense<0.000000e+00> : vector<8x64xf32>
    %94 = tpu.matmul %93, %81, %cst_34 {dimension_numbers = #tpu.dot_dimension_numbers<[1], [0], [0], [1], [0, 0, 1, 1], [], []>} : vector<8x8xf32>, vector<8x64xf32>, vector<8x64xf32> -> vector<8x64xf32>
    %c8_35 = arith.constant 8 : index
    %c64_36 = arith.constant 64 : index
    %95 = vector.load %arg9[%c8_35, %c64_36] : memref<16x192xf32, #tpu.memory_space<vmem>>, vector<8x64xf32>
    tpu.vector_store %arg9[%c8_35, %c64_36], %94 {strides = array<i32>} : memref<16x192xf32, #tpu.memory_space<vmem>>, vector<8x64xf32>,
    %96 = vector.extract_strided_slice %10 {offsets = [8, 128], sizes = [8, 64], strides = [1, 1]} : vector<16x576xf32> to vector<8x64xf32>
    %97 = vector.extract_strided_slice %10 {offsets = [8, 320], sizes = [8, 64], strides = [1, 1]} : vector<16x576xf32> to vector<8x64xf32>
    %98 = vector.extract_strided_slice %10 {offsets = [8, 512], sizes = [8, 64], strides = [1, 1]} : vector<16x576xf32> to vector<8x64xf32>
    %cst_37 = arith.constant dense<0.000000e+00> : vector<8x8xf32>
    %99 = tpu.matmul %96, %97, %cst_37 {dimension_numbers = #tpu.dot_dimension_numbers<[1], [1], [0], [0], [0, 0, 1, 0], [], []>} : vector<8x64xf32>, vector<8x64xf32>, vector<8x8xf32> -> vector<8x8xf32>
    %100 = vector.broadcast %1 : f32 to vector<8x8xf32>
    %101 = arith.mulf %99, %100 : vector<8x8xf32>
    %cst_38 = arith.constant dense<0xFF800000> : vector<8xf32>
    %102 = vector.multi_reduction <maximumf>, %101, %cst_38 [1] : vector<8x8xf32> to vector<8xf32>
    %103 = vector.shape_cast %102 : vector<8xf32> to vector<8x1xf32>
    %104 = vector.broadcast %103 : vector<8x1xf32> to vector<8x8xf32>
    %105 = arith.subf %101, %104 : vector<8x8xf32>
    %106 = math.exp %105 : vector<8x8xf32>
    %cst_39 = arith.constant dense<0.000000e+00> : vector<8xf32>
    %107 = vector.multi_reduction <add>, %106, %cst_39 [1] : vector<8x8xf32> to vector<8xf32>
    %108 = vector.shape_cast %107 : vector<8xf32> to vector<8x1xf32>
    %109 = vector.broadcast %108 : vector<8x1xf32> to vector<8x8xf32>
    %110 = arith.divf %106, %109 : vector<8x8xf32>
    %cst_40 = arith.constant dense<0.000000e+00> : vector<8x64xf32>
    %111 = tpu.matmul %110, %98, %cst_40 {dimension_numbers = #tpu.dot_dimension_numbers<[1], [0], [0], [1], [0, 0, 1, 1], [], []>} : vector<8x8xf32>, vector<8x64xf32>, vector<8x64xf32> -> vector<8x64xf32>
    %c8_41 = arith.constant 8 : index
    %c128_42 = arith.constant 128 : index
    %112 = vector.load %arg9[%c8_41, %c128_42] : memref<16x192xf32, #tpu.memory_space<vmem>>, vector<8x64xf32>
    tpu.vector_store %arg9[%c8_41, %c128_42], %111 {strides = array<i32>} : memref<16x192xf32, #tpu.memory_space<vmem>>, vector<8x64xf32>,
    %c0_43 = arith.constant 0 : index
    %c0_44 = arith.constant 0 : index
    %113 = vector.load %arg9[%c0_43, %c0_44] : memref<16x192xf32, #tpu.memory_space<vmem>>, vector<16x192xf32>
    %c0_45 = arith.constant 0 : index
    %c0_46 = arith.constant 0 : index
    %c0_47 = arith.constant 0 : index
    %114 = vector.load %arg4[%c0_45, %c0_46, %c0_47] : memref<2x192x32xf32, #tpu.memory_space<vmem>>, vector<1x192x32xf32>
    %115 = vector.shape_cast %114 : vector<1x192x32xf32> to vector<192x32xf32>
    %cst_48 = arith.constant dense<0.000000e+00> : vector<16x32xf32>
    %116 = tpu.matmul %113, %115, %cst_48 {dimension_numbers = #tpu.dot_dimension_numbers<[1], [0], [0], [1], [0, 0, 1, 1], [], []>} : vector<16x192xf32>, vector<192x32xf32>, vector<16x32xf32> -> vector<16x32xf32>
    %c0_49 = arith.constant 0 : index
    %c0_50 = arith.constant 0 : index
    %c0_51 = arith.constant 0 : index
    %117 = vector.load %arg5[%c0_49, %c0_50, %c0_51] : memref<2x1x32xf32, #tpu.memory_space<vmem>>, vector<1x1x32xf32>
    %118 = vector.shape_cast %117 : vector<1x1x32xf32> to vector<1x32xf32>
    %119 = vector.broadcast %118 : vector<1x32xf32> to vector<16x32xf32>
    %120 = arith.addf %116, %119 : vector<16x32xf32>
    %121 = arith.addf %120, %3 : vector<16x32xf32>
    %cst_52 = arith.constant dense<0.000000e+00> : vector<16xf32>
    %122 = vector.multi_reduction <add>, %121, %cst_52 [1] : vector<16x32xf32> to vector<16xf32>
    %123 = vector.shape_cast %122 : vector<16xf32> to vector<16x1xf32>
    %cst_53 = arith.constant 3.200000e+01 : f32
    %124 = vector.broadcast %cst_53 : f32 to vector<16x1xf32>
    %125 = arith.divf %123, %124 : vector<16x1xf32>
    %126 = vector.broadcast %125 : vector<16x1xf32> to vector<16x32xf32>
    %127 = arith.subf %121, %126 : vector<16x32xf32>
    %128 = arith.mulf %127, %127 : vector<16x32xf32>
    %cst_54 = arith.constant dense<0.000000e+00> : vector<16xf32>
    %129 = vector.multi_reduction <add>, %128, %cst_54 [1] : vector<16x32xf32> to vector<16xf32>
    %130 = vector.shape_cast %129 : vector<16xf32> to vector<16x1xf32>
    %cst_55 = arith.constant 3.200000e+01 : f32
    %131 = vector.broadcast %cst_55 : f32 to vector<16x1xf32>
    %132 = arith.divf %130, %131 : vector<16x1xf32>
    %133 = vector.broadcast %125 : vector<16x1xf32> to vector<16x32xf32>
    %134 = arith.subf %121, %133 : vector<16x32xf32>
    %cst_56 = arith.constant 9.99999974E-6 : f32
    %135 = vector.broadcast %cst_56 : f32 to vector<16x1xf32>
    %136 = arith.addf %132, %135 : vector<16x1xf32>
    %137 = math.rsqrt %136 : vector<16x1xf32>
    %138 = vector.broadcast %137 : vector<16x1xf32> to vector<16x32xf32>
    %139 = arith.mulf %134, %138 : vector<16x32xf32>
    %c0_57 = arith.constant 0 : index
    %c0_58 = arith.constant 0 : index
    %c0_59 = arith.constant 0 : index
    %140 = vector.load %arg6[%c0_57, %c0_58, %c0_59] : memref<2x1x32xf32, #tpu.memory_space<vmem>>, vector<1x1x32xf32>
    %141 = vector.shape_cast %140 : vector<1x1x32xf32> to vector<1x32xf32>
    %142 = vector.broadcast %141 : vector<1x32xf32> to vector<16x32xf32>
    %143 = arith.mulf %139, %142 : vector<16x32xf32>
    %c0_60 = arith.constant 0 : index
    %c0_61 = arith.constant 0 : index
    %c0_62 = arith.constant 0 : index
    %144 = vector.load %arg7[%c0_60, %c0_61, %c0_62] : memref<2x1x32xf32, #tpu.memory_space<vmem>>, vector<1x1x32xf32>
    %145 = vector.shape_cast %144 : vector<1x1x32xf32> to vector<1x32xf32>
    %146 = vector.broadcast %145 : vector<1x32xf32> to vector<16x32xf32>
    %147 = arith.addf %143, %146 : vector<16x32xf32>
    %c1 = arith.constant 1 : index
    %c0_63 = arith.constant 0 : index
    %c0_64 = arith.constant 0 : index
    %148 = vector.load %arg2[%c1, %c0_63, %c0_64] : memref<2x32x576xf32, #tpu.memory_space<vmem>>, vector<1x32x576xf32>
    %149 = vector.shape_cast %148 : vector<1x32x576xf32> to vector<32x576xf32>
    %cst_65 = arith.constant dense<0.000000e+00> : vector<16x576xf32>
    %150 = tpu.matmul %147, %149, %cst_65 {dimension_numbers = #tpu.dot_dimension_numbers<[1], [0], [0], [1], [0, 0, 1, 1], [], []>} : vector<16x32xf32>, vector<32x576xf32>, vector<16x576xf32> -> vector<16x576xf32>
    %c1_66 = arith.constant 1 : index
    %c0_67 = arith.constant 0 : index
    %c0_68 = arith.constant 0 : index
    %151 = vector.load %arg3[%c1_66, %c0_67, %c0_68] : memref<2x1x576xf32, #tpu.memory_space<vmem>>, vector<1x1x576xf32>
    %152 = vector.shape_cast %151 : vector<1x1x576xf32> to vector<1x576xf32>
    %153 = vector.broadcast %152 : vector<1x576xf32> to vector<16x576xf32>
    %154 = arith.addf %150, %153 : vector<16x576xf32>
    %155 = vector.extract_strided_slice %154 {offsets = [0, 0], sizes = [8, 64], strides = [1, 1]} : vector<16x576xf32> to vector<8x64xf32>
    %156 = vector.extract_strided_slice %154 {offsets = [0, 192], sizes = [8, 64], strides = [1, 1]} : vector<16x576xf32> to vector<8x64xf32>
    %157 = vector.extract_strided_slice %154 {offsets = [0, 384], sizes = [8, 64], strides = [1, 1]} : vector<16x576xf32> to vector<8x64xf32>
    %cst_69 = arith.constant dense<0.000000e+00> : vector<8x8xf32>
    %158 = tpu.matmul %155, %156, %cst_69 {dimension_numbers = #tpu.dot_dimension_numbers<[1], [1], [0], [0], [0, 0, 1, 0], [], []>} : vector<8x64xf32>, vector<8x64xf32>, vector<8x8xf32> -> vector<8x8xf32>
    %159 = vector.broadcast %1 : f32 to vector<8x8xf32>
    %160 = arith.mulf %158, %159 : vector<8x8xf32>
    %cst_70 = arith.constant dense<0xFF800000> : vector<8xf32>
    %161 = vector.multi_reduction <maximumf>, %160, %cst_70 [1] : vector<8x8xf32> to vector<8xf32>
    %162 = vector.shape_cast %161 : vector<8xf32> to vector<8x1xf32>
    %163 = vector.broadcast %162 : vector<8x1xf32> to vector<8x8xf32>
    %164 = arith.subf %160, %163 : vector<8x8xf32>
    %165 = math.exp %164 : vector<8x8xf32>
    %cst_71 = arith.constant dense<0.000000e+00> : vector<8xf32>
    %166 = vector.multi_reduction <add>, %165, %cst_71 [1] : vector<8x8xf32> to vector<8xf32>
    %167 = vector.shape_cast %166 : vector<8xf32> to vector<8x1xf32>
    %168 = vector.broadcast %167 : vector<8x1xf32> to vector<8x8xf32>
    %169 = arith.divf %165, %168 : vector<8x8xf32>
    %cst_72 = arith.constant dense<0.000000e+00> : vector<8x64xf32>
    %170 = tpu.matmul %169, %157, %cst_72 {dimension_numbers = #tpu.dot_dimension_numbers<[1], [0], [0], [1], [0, 0, 1, 1], [], []>} : vector<8x8xf32>, vector<8x64xf32>, vector<8x64xf32> -> vector<8x64xf32>
    %c0_73 = arith.constant 0 : index
    %c0_74 = arith.constant 0 : index
    %171 = vector.load %arg9[%c0_73, %c0_74] : memref<16x192xf32, #tpu.memory_space<vmem>>, vector<8x64xf32>
    tpu.vector_store %arg9[%c0_73, %c0_74], %170 {strides = array<i32>} : memref<16x192xf32, #tpu.memory_space<vmem>>, vector<8x64xf32>,
    %172 = vector.extract_strided_slice %154 {offsets = [0, 64], sizes = [8, 64], strides = [1, 1]} : vector<16x576xf32> to vector<8x64xf32>
    %173 = vector.extract_strided_slice %154 {offsets = [0, 256], sizes = [8, 64], strides = [1, 1]} : vector<16x576xf32> to vector<8x64xf32>
    %174 = vector.extract_strided_slice %154 {offsets = [0, 448], sizes = [8, 64], strides = [1, 1]} : vector<16x576xf32> to vector<8x64xf32>
    %cst_75 = arith.constant dense<0.000000e+00> : vector<8x8xf32>
    %175 = tpu.matmul %172, %173, %cst_75 {dimension_numbers = #tpu.dot_dimension_numbers<[1], [1], [0], [0], [0, 0, 1, 0], [], []>} : vector<8x64xf32>, vector<8x64xf32>, vector<8x8xf32> -> vector<8x8xf32>
    %176 = vector.broadcast %1 : f32 to vector<8x8xf32>
    %177 = arith.mulf %175, %176 : vector<8x8xf32>
    %cst_76 = arith.constant dense<0xFF800000> : vector<8xf32>
    %178 = vector.multi_reduction <maximumf>, %177, %cst_76 [1] : vector<8x8xf32> to vector<8xf32>
    %179 = vector.shape_cast %178 : vector<8xf32> to vector<8x1xf32>
    %180 = vector.broadcast %179 : vector<8x1xf32> to vector<8x8xf32>
    %181 = arith.subf %177, %180 : vector<8x8xf32>
    %182 = math.exp %181 : vector<8x8xf32>
    %cst_77 = arith.constant dense<0.000000e+00> : vector<8xf32>
    %183 = vector.multi_reduction <add>, %182, %cst_77 [1] : vector<8x8xf32> to vector<8xf32>
    %184 = vector.shape_cast %183 : vector<8xf32> to vector<8x1xf32>
    %185 = vector.broadcast %184 : vector<8x1xf32> to vector<8x8xf32>
    %186 = arith.divf %182, %185 : vector<8x8xf32>
    %cst_78 = arith.constant dense<0.000000e+00> : vector<8x64xf32>
    %187 = tpu.matmul %186, %174, %cst_78 {dimension_numbers = #tpu.dot_dimension_numbers<[1], [0], [0], [1], [0, 0, 1, 1], [], []>} : vector<8x8xf32>, vector<8x64xf32>, vector<8x64xf32> -> vector<8x64xf32>
    %c0_79 = arith.constant 0 : index
    %c64_80 = arith.constant 64 : index
    %188 = vector.load %arg9[%c0_79, %c64_80] : memref<16x192xf32, #tpu.memory_space<vmem>>, vector<8x64xf32>
    tpu.vector_store %arg9[%c0_79, %c64_80], %187 {strides = array<i32>} : memref<16x192xf32, #tpu.memory_space<vmem>>, vector<8x64xf32>,
    %189 = vector.extract_strided_slice %154 {offsets = [0, 128], sizes = [8, 64], strides = [1, 1]} : vector<16x576xf32> to vector<8x64xf32>
    %190 = vector.extract_strided_slice %154 {offsets = [0, 320], sizes = [8, 64], strides = [1, 1]} : vector<16x576xf32> to vector<8x64xf32>
    %191 = vector.extract_strided_slice %154 {offsets = [0, 512], sizes = [8, 64], strides = [1, 1]} : vector<16x576xf32> to vector<8x64xf32>
    %cst_81 = arith.constant dense<0.000000e+00> : vector<8x8xf32>
    %192 = tpu.matmul %189, %190, %cst_81 {dimension_numbers = #tpu.dot_dimension_numbers<[1], [1], [0], [0], [0, 0, 1, 0], [], []>} : vector<8x64xf32>, vector<8x64xf32>, vector<8x8xf32> -> vector<8x8xf32>
    %193 = vector.broadcast %1 : f32 to vector<8x8xf32>
    %194 = arith.mulf %192, %193 : vector<8x8xf32>
    %cst_82 = arith.constant dense<0xFF800000> : vector<8xf32>
    %195 = vector.multi_reduction <maximumf>, %194, %cst_82 [1] : vector<8x8xf32> to vector<8xf32>
    %196 = vector.shape_cast %195 : vector<8xf32> to vector<8x1xf32>
    %197 = vector.broadcast %196 : vector<8x1xf32> to vector<8x8xf32>
    %198 = arith.subf %194, %197 : vector<8x8xf32>
    %199 = math.exp %198 : vector<8x8xf32>
    %cst_83 = arith.constant dense<0.000000e+00> : vector<8xf32>
    %200 = vector.multi_reduction <add>, %199, %cst_83 [1] : vector<8x8xf32> to vector<8xf32>
    %201 = vector.shape_cast %200 : vector<8xf32> to vector<8x1xf32>
    %202 = vector.broadcast %201 : vector<8x1xf32> to vector<8x8xf32>
    %203 = arith.divf %199, %202 : vector<8x8xf32>
    %cst_84 = arith.constant dense<0.000000e+00> : vector<8x64xf32>
    %204 = tpu.matmul %203, %191, %cst_84 {dimension_numbers = #tpu.dot_dimension_numbers<[1], [0], [0], [1], [0, 0, 1, 1], [], []>} : vector<8x8xf32>, vector<8x64xf32>, vector<8x64xf32> -> vector<8x64xf32>
    %c0_85 = arith.constant 0 : index
    %c128_86 = arith.constant 128 : index
    %205 = vector.load %arg9[%c0_85, %c128_86] : memref<16x192xf32, #tpu.memory_space<vmem>>, vector<8x64xf32>
    tpu.vector_store %arg9[%c0_85, %c128_86], %204 {strides = array<i32>} : memref<16x192xf32, #tpu.memory_space<vmem>>, vector<8x64xf32>,
    %206 = vector.extract_strided_slice %154 {offsets = [8, 0], sizes = [8, 64], strides = [1, 1]} : vector<16x576xf32> to vector<8x64xf32>
    %207 = vector.extract_strided_slice %154 {offsets = [8, 192], sizes = [8, 64], strides = [1, 1]} : vector<16x576xf32> to vector<8x64xf32>
    %208 = vector.extract_strided_slice %154 {offsets = [8, 384], sizes = [8, 64], strides = [1, 1]} : vector<16x576xf32> to vector<8x64xf32>
    %cst_87 = arith.constant dense<0.000000e+00> : vector<8x8xf32>
    %209 = tpu.matmul %206, %207, %cst_87 {dimension_numbers = #tpu.dot_dimension_numbers<[1], [1], [0], [0], [0, 0, 1, 0], [], []>} : vector<8x64xf32>, vector<8x64xf32>, vector<8x8xf32> -> vector<8x8xf32>
    %210 = vector.broadcast %1 : f32 to vector<8x8xf32>
    %211 = arith.mulf %209, %210 : vector<8x8xf32>
    %cst_88 = arith.constant dense<0xFF800000> : vector<8xf32>
    %212 = vector.multi_reduction <maximumf>, %211, %cst_88 [1] : vector<8x8xf32> to vector<8xf32>
    %213 = vector.shape_cast %212 : vector<8xf32> to vector<8x1xf32>
    %214 = vector.broadcast %213 : vector<8x1xf32> to vector<8x8xf32>
    %215 = arith.subf %211, %214 : vector<8x8xf32>
    %216 = math.exp %215 : vector<8x8xf32>
    %cst_89 = arith.constant dense<0.000000e+00> : vector<8xf32>
    %217 = vector.multi_reduction <add>, %216, %cst_89 [1] : vector<8x8xf32> to vector<8xf32>
    %218 = vector.shape_cast %217 : vector<8xf32> to vector<8x1xf32>
    %219 = vector.broadcast %218 : vector<8x1xf32> to vector<8x8xf32>
    %220 = arith.divf %216, %219 : vector<8x8xf32>
    %cst_90 = arith.constant dense<0.000000e+00> : vector<8x64xf32>
    %221 = tpu.matmul %220, %208, %cst_90 {dimension_numbers = #tpu.dot_dimension_numbers<[1], [0], [0], [1], [0, 0, 1, 1], [], []>} : vector<8x8xf32>, vector<8x64xf32>, vector<8x64xf32> -> vector<8x64xf32>
    %c8_91 = arith.constant 8 : index
    %c0_92 = arith.constant 0 : index
    %222 = vector.load %arg9[%c8_91, %c0_92] : memref<16x192xf32, #tpu.memory_space<vmem>>, vector<8x64xf32>
    tpu.vector_store %arg9[%c8_91, %c0_92], %221 {strides = array<i32>} : memref<16x192xf32, #tpu.memory_space<vmem>>, vector<8x64xf32>,
    %223 = vector.extract_strided_slice %154 {offsets = [8, 64], sizes = [8, 64], strides = [1, 1]} : vector<16x576xf32> to vector<8x64xf32>
    %224 = vector.extract_strided_slice %154 {offsets = [8, 256], sizes = [8, 64], strides = [1, 1]} : vector<16x576xf32> to vector<8x64xf32>
    %225 = vector.extract_strided_slice %154 {offsets = [8, 448], sizes = [8, 64], strides = [1, 1]} : vector<16x576xf32> to vector<8x64xf32>
    %cst_93 = arith.constant dense<0.000000e+00> : vector<8x8xf32>
    %226 = tpu.matmul %223, %224, %cst_93 {dimension_numbers = #tpu.dot_dimension_numbers<[1], [1], [0], [0], [0, 0, 1, 0], [], []>} : vector<8x64xf32>, vector<8x64xf32>, vector<8x8xf32> -> vector<8x8xf32>
    %227 = vector.broadcast %1 : f32 to vector<8x8xf32>
    %228 = arith.mulf %226, %227 : vector<8x8xf32>
    %cst_94 = arith.constant dense<0xFF800000> : vector<8xf32>
    %229 = vector.multi_reduction <maximumf>, %228, %cst_94 [1] : vector<8x8xf32> to vector<8xf32>
    %230 = vector.shape_cast %229 : vector<8xf32> to vector<8x1xf32>
    %231 = vector.broadcast %230 : vector<8x1xf32> to vector<8x8xf32>
    %232 = arith.subf %228, %231 : vector<8x8xf32>
    %233 = math.exp %232 : vector<8x8xf32>
    %cst_95 = arith.constant dense<0.000000e+00> : vector<8xf32>
    %234 = vector.multi_reduction <add>, %233, %cst_95 [1] : vector<8x8xf32> to vector<8xf32>
    %235 = vector.shape_cast %234 : vector<8xf32> to vector<8x1xf32>
    %236 = vector.broadcast %235 : vector<8x1xf32> to vector<8x8xf32>
    %237 = arith.divf %233, %236 : vector<8x8xf32>
    %cst_96 = arith.constant dense<0.000000e+00> : vector<8x64xf32>
    %238 = tpu.matmul %237, %225, %cst_96 {dimension_numbers = #tpu.dot_dimension_numbers<[1], [0], [0], [1], [0, 0, 1, 1], [], []>} : vector<8x8xf32>, vector<8x64xf32>, vector<8x64xf32> -> vector<8x64xf32>
    %c8_97 = arith.constant 8 : index
    %c64_98 = arith.constant 64 : index
    %239 = vector.load %arg9[%c8_97, %c64_98] : memref<16x192xf32, #tpu.memory_space<vmem>>, vector<8x64xf32>
    tpu.vector_store %arg9[%c8_97, %c64_98], %238 {strides = array<i32>} : memref<16x192xf32, #tpu.memory_space<vmem>>, vector<8x64xf32>,
    %240 = vector.extract_strided_slice %154 {offsets = [8, 128], sizes = [8, 64], strides = [1, 1]} : vector<16x576xf32> to vector<8x64xf32>
    %241 = vector.extract_strided_slice %154 {offsets = [8, 320], sizes = [8, 64], strides = [1, 1]} : vector<16x576xf32> to vector<8x64xf32>
    %242 = vector.extract_strided_slice %154 {offsets = [8, 512], sizes = [8, 64], strides = [1, 1]} : vector<16x576xf32> to vector<8x64xf32>
    %cst_99 = arith.constant dense<0.000000e+00> : vector<8x8xf32>
    %243 = tpu.matmul %240, %241, %cst_99 {dimension_numbers = #tpu.dot_dimension_numbers<[1], [1], [0], [0], [0, 0, 1, 0], [], []>} : vector<8x64xf32>, vector<8x64xf32>, vector<8x8xf32> -> vector<8x8xf32>
    %244 = vector.broadcast %1 : f32 to vector<8x8xf32>
    %245 = arith.mulf %243, %244 : vector<8x8xf32>
    %cst_100 = arith.constant dense<0xFF800000> : vector<8xf32>
    %246 = vector.multi_reduction <maximumf>, %245, %cst_100 [1] : vector<8x8xf32> to vector<8xf32>
    %247 = vector.shape_cast %246 : vector<8xf32> to vector<8x1xf32>
    %248 = vector.broadcast %247 : vector<8x1xf32> to vector<8x8xf32>
    %249 = arith.subf %245, %248 : vector<8x8xf32>
    %250 = math.exp %249 : vector<8x8xf32>
    %cst_101 = arith.constant dense<0.000000e+00> : vector<8xf32>
    %251 = vector.multi_reduction <add>, %250, %cst_101 [1] : vector<8x8xf32> to vector<8xf32>
    %252 = vector.shape_cast %251 : vector<8xf32> to vector<8x1xf32>
    %253 = vector.broadcast %252 : vector<8x1xf32> to vector<8x8xf32>
    %254 = arith.divf %250, %253 : vector<8x8xf32>
    %cst_102 = arith.constant dense<0.000000e+00> : vector<8x64xf32>
    %255 = tpu.matmul %254, %242, %cst_102 {dimension_numbers = #tpu.dot_dimension_numbers<[1], [0], [0], [1], [0, 0, 1, 1], [], []>} : vector<8x8xf32>, vector<8x64xf32>, vector<8x64xf32> -> vector<8x64xf32>
    %c8_103 = arith.constant 8 : index
    %c128_104 = arith.constant 128 : index
    %256 = vector.load %arg9[%c8_103, %c128_104] : memref<16x192xf32, #tpu.memory_space<vmem>>, vector<8x64xf32>
    tpu.vector_store %arg9[%c8_103, %c128_104], %255 {strides = array<i32>} : memref<16x192xf32, #tpu.memory_space<vmem>>, vector<8x64xf32>,
    %c0_105 = arith.constant 0 : index
    %c0_106 = arith.constant 0 : index
    %257 = vector.load %arg9[%c0_105, %c0_106] : memref<16x192xf32, #tpu.memory_space<vmem>>, vector<16x192xf32>
    %c1_107 = arith.constant 1 : index
    %c0_108 = arith.constant 0 : index
    %c0_109 = arith.constant 0 : index
    %258 = vector.load %arg4[%c1_107, %c0_108, %c0_109] : memref<2x192x32xf32, #tpu.memory_space<vmem>>, vector<1x192x32xf32>
    %259 = vector.shape_cast %258 : vector<1x192x32xf32> to vector<192x32xf32>
    %cst_110 = arith.constant dense<0.000000e+00> : vector<16x32xf32>
    %260 = tpu.matmul %257, %259, %cst_110 {dimension_numbers = #tpu.dot_dimension_numbers<[1], [0], [0], [1], [0, 0, 1, 1], [], []>} : vector<16x192xf32>, vector<192x32xf32>, vector<16x32xf32> -> vector<16x32xf32>
    %c1_111 = arith.constant 1 : index
    %c0_112 = arith.constant 0 : index
    %c0_113 = arith.constant 0 : index
    %261 = vector.load %arg5[%c1_111, %c0_112, %c0_113] : memref<2x1x32xf32, #tpu.memory_space<vmem>>, vector<1x1x32xf32>
    %262 = vector.shape_cast %261 : vector<1x1x32xf32> to vector<1x32xf32>
    %263 = vector.broadcast %262 : vector<1x32xf32> to vector<16x32xf32>
    %264 = arith.addf %260, %263 : vector<16x32xf32>
    %265 = arith.addf %264, %147 : vector<16x32xf32>
    %cst_114 = arith.constant dense<0.000000e+00> : vector<16xf32>
    %266 = vector.multi_reduction <add>, %265, %cst_114 [1] : vector<16x32xf32> to vector<16xf32>
    %267 = vector.shape_cast %266 : vector<16xf32> to vector<16x1xf32>
    %cst_115 = arith.constant 3.200000e+01 : f32
    %268 = vector.broadcast %cst_115 : f32 to vector<16x1xf32>
    %269 = arith.divf %267, %268 : vector<16x1xf32>
    %270 = vector.broadcast %269 : vector<16x1xf32> to vector<16x32xf32>
    %271 = arith.subf %265, %270 : vector<16x32xf32>
    %272 = arith.mulf %271, %271 : vector<16x32xf32>
    %cst_116 = arith.constant dense<0.000000e+00> : vector<16xf32>
    %273 = vector.multi_reduction <add>, %272, %cst_116 [1] : vector<16x32xf32> to vector<16xf32>
    %274 = vector.shape_cast %273 : vector<16xf32> to vector<16x1xf32>
    %cst_117 = arith.constant 3.200000e+01 : f32
    %275 = vector.broadcast %cst_117 : f32 to vector<16x1xf32>
    %276 = arith.divf %274, %275 : vector<16x1xf32>
    %277 = vector.broadcast %269 : vector<16x1xf32> to vector<16x32xf32>
    %278 = arith.subf %265, %277 : vector<16x32xf32>
    %cst_118 = arith.constant 9.99999974E-6 : f32
    %279 = vector.broadcast %cst_118 : f32 to vector<16x1xf32>
    %280 = arith.addf %276, %279 : vector<16x1xf32>
    %281 = math.rsqrt %280 : vector<16x1xf32>
    %282 = vector.broadcast %281 : vector<16x1xf32> to vector<16x32xf32>
    %283 = arith.mulf %278, %282 : vector<16x32xf32>
    %c1_119 = arith.constant 1 : index
    %c0_120 = arith.constant 0 : index
    %c0_121 = arith.constant 0 : index
    %284 = vector.load %arg6[%c1_119, %c0_120, %c0_121] : memref<2x1x32xf32, #tpu.memory_space<vmem>>, vector<1x1x32xf32>
    %285 = vector.shape_cast %284 : vector<1x1x32xf32> to vector<1x32xf32>
    %286 = vector.broadcast %285 : vector<1x32xf32> to vector<16x32xf32>
    %287 = arith.mulf %283, %286 : vector<16x32xf32>
    %c1_122 = arith.constant 1 : index
    %c0_123 = arith.constant 0 : index
    %c0_124 = arith.constant 0 : index
    %288 = vector.load %arg7[%c1_122, %c0_123, %c0_124] : memref<2x1x32xf32, #tpu.memory_space<vmem>>, vector<1x1x32xf32>
    %289 = vector.shape_cast %288 : vector<1x1x32xf32> to vector<1x32xf32>
    %290 = vector.broadcast %289 : vector<1x32xf32> to vector<16x32xf32>
    %291 = arith.addf %287, %290 : vector<16x32xf32>
    %292 = vector.shape_cast %291 : vector<16x32xf32> to vector<2x8x32xf32>
    %c0_125 = arith.constant 0 : index
    %c0_126 = arith.constant 0 : index
    %c0_127 = arith.constant 0 : index
    %293 = vector.load %arg8[%c0_125, %c0_126, %c0_127] : memref<2x8x32xf32, #tpu.memory_space<vmem>>, vector<2x8x32xf32>
    tpu.vector_store %arg8[%c0_125, %c0_126, %c0_127], %292 {strides = array<i32>} : memref<2x8x32xf32, #tpu.memory_space<vmem>>, vector<2x8x32xf32>,
    return
  }
  func.func @transform_0(%arg0: i32) -> (i32, i32, i32) {
    %c0_i32 = arith.constant 0 : i32
    %c0_i32_0 = arith.constant 0 : i32
    %c0_i32_1 = arith.constant 0 : i32
    return %arg0, %c0_i32, %c0_i32_0 : i32, i32, i32
  }
  func.func @transform_1(%arg0: i32) -> (i32, i32, i32) {
    %c0_i32 = arith.constant 0 : i32
    %c0_i32_0 = arith.constant 0 : i32
    %c0_i32_1 = arith.constant 0 : i32
    %c0_i32_2 = arith.constant 0 : i32
    return %c0_i32, %c0_i32_0, %c0_i32_1 : i32, i32, i32
  }
  func.func @transform_2(%arg0: i32) -> (i32, i32, i32) {
    %c0_i32 = arith.constant 0 : i32
    %c0_i32_0 = arith.constant 0 : i32
    %c0_i32_1 = arith.constant 0 : i32
    %c0_i32_2 = arith.constant 0 : i32
    return %c0_i32, %c0_i32_0, %c0_i32_1 : i32, i32, i32
  }
  func.func @transform_3(%arg0: i32) -> (i32, i32, i32) {
    %c0_i32 = arith.constant 0 : i32
    %c0_i32_0 = arith.constant 0 : i32
    %c0_i32_1 = arith.constant 0 : i32
    %c0_i32_2 = arith.constant 0 : i32
    return %c0_i32, %c0_i32_0, %c0_i32_1 : i32, i32, i32
  }
  func.func @transform_4(%arg0: i32) -> (i32, i32, i32) {
    %c0_i32 = arith.constant 0 : i32
    %c0_i32_0 = arith.constant 0 : i32
    %c0_i32_1 = arith.constant 0 : i32
    %c0_i32_2 = arith.constant 0 : i32
    return %c0_i32, %c0_i32_0, %c0_i32_1 : i32, i32, i32
  }
  func.func @transform_5(%arg0: i32) -> (i32, i32, i32) {
    %c0_i32 = arith.constant 0 : i32
    %c0_i32_0 = arith.constant 0 : i32
    %c0_i32_1 = arith.constant 0 : i32
    %c0_i32_2 = arith.constant 0 : i32
    return %c0_i32, %c0_i32_0, %c0_i32_1 : i32, i32, i32
  }
  func.func @transform_6(%arg0: i32) -> (i32, i32, i32) {
    %c0_i32 = arith.constant 0 : i32
    %c0_i32_0 = arith.constant 0 : i32
    %c0_i32_1 = arith.constant 0 : i32
    %c0_i32_2 = arith.constant 0 : i32
    return %c0_i32, %c0_i32_0, %c0_i32_1 : i32, i32, i32
  }
  func.func @transform_7(%arg0: i32) -> (i32, i32, i32) {
    %c0_i32 = arith.constant 0 : i32
    %c0_i32_0 = arith.constant 0 : i32
    %c0_i32_1 = arith.constant 0 : i32
    return %arg0, %c0_i32, %c0_i32_0 : i32, i32, i32
  }
}

</mosaic_0001>

<bundles_post_ra>
// kernel: tpu_custom_call.1
= control target key start
LH: loop header
LB: loop body
LE: loop exit
PB: predicated region body
PF: predicated region fallthrough
CT: control target
= control target key end

     0   :  { %v3449_v7 = vmov 0.0   ;;  %s4140_s0 = inlined_call_operand.vmem [shape: f32[2,8,32], index: 0, kind: input, shape index: {}]   ;;  %s4141_s1 = inlined_call_operand.vmem [shape: f32[2,32,576], index: 1, kind: input, shape index: {}]   ;;  %s4142_s2 = inlined_call_operand.vmem [shape: f32[2,1,576], index: 2, kind: input, shape index: {}]   ;;  %s4143_s3 = inlined_call_operand.vmem [shape: f32[2,192,32], index: 3, kind: input, shape index: {}]   ;;  %s4144_s4 = inlined_call_operand.vmem [shape: f32[2,1,32], index: 4, kind: input, shape index: {}]   ;;  %s4145_s5 = inlined_call_operand.vmem [shape: f32[2,1,32], index: 5, kind: input, shape index: {}]   ;;  %s4146_s6 = inlined_call_operand.vmem [shape: f32[2,1,32], index: 6, kind: input, shape index: {}]   ;;  %s4147_s7 = inlined_call_operand.hbm [shape: f32[2,8,32], index: 7, kind: output, shape index: {}]  }
   0x1   :  { %v30_v0 = vld [vmem:[%s4141_s1 + $0x8] sm:$0xff]  ;;  %v35_v1 = vld [vmem:[%s4141_s1 + $0x30] sm:$0xff]  ;;  %v29_v2 = vld [vmem:[%s4141_s1] sm:$0xff]  ;;  %147 = vmatprep.mubr.f32.mxu1 %v3449_v7  ;;  %3126 = vmatprep.subr.mxu0 %v3449_v7 }
   0x2   :  { %v3242_v3 = vpack.c.bf16 %v35_v1, %v30_v0  ;;  %v34_v4 = vld [vmem:[%s4141_s1 + $0x28] sm:$0xff]  ;;  %v40_v5 = vld [vmem:[%s4141_s1 + $0x58] sm:$0xff]  ;;  %v45_v6 = vld [vmem:[%s4141_s1 + $0x80] sm:$0xff] }
   0x3   :  { %v3244_v8 = vpack.c.bf16 %v34_v4, %v29_v2  ;;  %v3246_v9 = vpack.c.bf16 %v45_v6, %v40_v5  ;;  %v39_v10 = vld [vmem:[%s4141_s1 + $0x50] sm:$0xff]  ;;  %v44_v11 = vld [vmem:[%s4141_s1 + $0x78] sm:$0xff] }
   0x4   :  { %3243 = vmatprep.subr.bf16.mxu1 %v3242_v3 }
   0x5   :  { %12 = vsyncpa [#allocation4], 0  ;;  %3245 = vmatpush1.bf16.msra.mxu1 %v3244_v8  ;;  %v3248_v12 = vpack.c.bf16 %v44_v11, %v39_v10  ;;  %v3525_v13 = vld [vmem:[%s4140_s0] sm:$0xff]  ;;  %vm76_vm0 = vcmask 261120   ;;  %v32_v14 = vld [vmem:[%s4141_s1 + $0x18] sm:$0xff]  ;;  %v51_v33 = vlaneseq  ;;  %vm3450_vm1 = vmmov 0  }
   0x6   :  { %3247 = vmatprep.subr.bf16.mxu1 %v3246_v9  ;;  %v37_v15 = vld [vmem:[%s4141_s1 + $0x40] sm:$0xff]  ;;  %v31_v16 = vld [vmem:[%s4141_s1 + $0x10] sm:$0xff]  ;;  %v36_v18 = vld [vmem:[%s4141_s1 + $0x38] sm:$0xff]  ;;  %3128 = vmatprep.mubr.msk.f32.mxu0 %vm3450_vm1, %v3449_v7  ;;  %s3451_s23 = smov 64   ;;  %vm315_vm2 = vcmask 523264   ;;  %vm392_vm3 = vcmask 64512  }
   0x7   :  { %v3250_v17 = vpack.c.bf16 %v37_v15, %v32_v14  ;;  %v3545_v19 = vld [vmem:[%s4140_s0 + $0x8] sm:$0xff]  ;;  %v3252_v21 = vpack.c.bf16 %v36_v18, %v31_v16  ;;  %v47_v22 = vld [vmem:[%s4141_s1 + $0x90] sm:$0xff]  ;;  %v41_v23 = vld [vmem:[%s4141_s1 + $0x60] sm:$0xff]  ;;  %v3584_v34 = vshrl.u32 %v51_v33, 7  ;;  %vm648_vm4 = vcmask 1048064  }
   0x8   :  { %v42_v20 = vld [vmem:[%s4141_s1 + $0x68] sm:$0xff]  ;;  %v33_v26 = vld [vmem:[%s4141_s1 + $0x20] sm:$0xff]  ;;  %v43_v30 = vld [vmem:[%s4141_s1 + $0x70] sm:$0xff] }
   0x9   :  { %3249 = vmatpush1.bf16.msra.mxu1 %v3248_v12  ;;  %v46_v24 = vld [vmem:[%s4141_s1 + $0x88] sm:$0xff]  ;;  %v3254_v25 = vpack.c.bf16 %v47_v22, %v42_v20  ;;  %v48_v31 = vld [vmem:[%s4141_s1 + $0x98] sm:$0xff]  ;;  %v57_v35 = vsub.s32 1, %v3584_v34  ;;  %v49_v36 = vld [vmem:[%s4142_s2] sm:$0x1f]  ;;  %v61_v43 = vsub.s32 2, %v3584_v34 }
   0xa   :  { %3251 = vmatprep.subr.bf16.mxu1 %v3250_v17  ;;  %v38_v27 = vld [vmem:[%s4141_s1 + $0x48] sm:$0xff]  ;;  %v3256_v28 = vpack.c.bf16 %v46_v24, %v41_v23  ;;  %v3262_v32 = vpack.c.bf16 %v48_v31, %v43_v30  ;;  %v65_v46 = vsub.s32 3, %v3584_v34  ;;  %v69_v49 = vsub.s32 4, %v3584_v34 }
   0xb   :  { %v3258_v29 = vpack.c.bf16 %v38_v27, %v33_v26  ;;  %v58_v37 = vrot.slane %v49_v36, %v57_v35  ;;  %v62_v44 = vrot.slane %v49_v36, %v61_v43  ;;  %v53_v58 = vsub.s32 0, %v3584_v34 }
   0xc   :  { %2934 = vmatmul.mubr.msk.f32.vlgmr.msra.gmra.mrb[0].mxu1 %vm76_vm0, %v3525_v13  ;;  %v66_v50 = vrot.slane %v49_v36, %v65_v46  ;;  %v3609_v53 = vrot.slane %v49_v36, %v69_v49 }
   0xd   :  { %153 = vmatprep.mubr.f32.mxu1 %v3449_v7  ;;  %3253 = vmatpush1.bf16.msra.mxu1 %v3252_v21  ;;  %v54_v59 = vrot.slane %v49_v36, %v53_v58 }
   0xe   :  { %3255 = vmatprep.subr.bf16.mxu1 %v3254_v25 }
  0x10   :  { %2935 = vmatmul.mubr.msk.f32.gmra.mrb[2].mxu1 %vm76_vm0, %v3545_v19 }
  0x11   :  { %224 = vmatprep.mubr.f32.mxu1 %v3449_v7  ;;  %3257 = vmatpush1.bf16.msra.mxu1 %v3256_v28 }
  0x12   :  { %3259 = vmatprep.subr.bf16.mxu1 %v3258_v29 }
  0x14   :  { %2936 = vmatmul.mubr.msk.f32.vlgmr.msra.gmra.mrb[4].mxu1 %vm76_vm0, %v3525_v13 }
  0x15   :  { %3261 = vmatpush3.bf16.msra.mxu1 %v3258_v29  ;;  %230 = vmatprep.mubr.f32.mxu1 %v3449_v7 }
  0x16   :  { %3263 = vmatprep.subr.bf16.mxu1 %v3262_v32 }
  0x18   :  { %2937 = vmatmul.mubr.msk.f32.gmra.mrb[6].mxu1 %vm76_vm0, %v3545_v19 }
  0x19   :  { %3265 = vmatpush3.bf16.msra.mxu1 %v3262_v32  ;;  %3108 = vmatprep.mubr.msk.f32.mxu1 %vm76_vm0, %v3525_v13 }
  0x1a   :  { %3111 = vmatprep.subr.mxu1 %v3449_v7 }
  0x1c   :  { %3109 = vmatmul.mubr.msk.f32.vlgmr.msra.gmra.mrb[8].mxu1 %vm76_vm0, %v3545_v19 }
  0x1d   :  { %3113 = vmatprep.mubr.msk.f32.mxu1 %vm3450_vm1, %v3449_v7 }
  0xdf   :  { %v149_v38 = vpop.f32.mrb[0].mxu1 }
  0xe0   :  { %v151_v39 = vpop.f32.mrb[1].mxu1  ;;  %v150_v62 = vadd.f32 %v149_v38, %v54_v59 }
  0xe1   :  { %v3596_v40 = vadd.f32 %v151_v39, %v58_v37 }
  0xe3   :  { %313 = vrot.lane.b32.xlu0 %v3596_v40, %s3451_s23  ;;  %v155_v41 = vpop.f32.mrb[2].mxu1 }
  0xe4   :  { %v157_v42 = vpop.f32.mrb[3].mxu1  ;;  %v156_v11 = vadd.f32 %v155_v41, %v54_v59 }
  0xe5   :  { %v158_v10 = vadd.f32 %v157_v42, %v58_v37 }
  0xe7   :  { %v226_v45 = vpop.f32.mrb[4].mxu1 }
  0xe8   :  { %v227_v47 = vadd.f32 %v226_v45, %v62_v44  ;;  %v228_v48 = vpop.f32.mrb[5].mxu1 }
  0xe9   :  { %v3622_v61 = vadd.f32 %v228_v48, %v66_v50 }
  0xeb   :  { %v232_v51 = vpop.f32.mrb[6].mxu1 }
  0xec   :  { %v234_v52 = vpop.f32.mrb[7].mxu1  ;;  %v233_v3 = vadd.f32 %v232_v51, %v62_v44 }
  0xed   :  { %v3611_v54 = vadd.f32 %v234_v52, %v66_v50 }
  0xef   :  { %v3110_v55 = vpop.f32.mrb[8].mxu1 }
  0xf0   :  { %v3614_v56 = vadd.f32 %v3110_v55, %v3609_v53  ;;  %v3616_v57 = vpop.f32.mrb[9].mxu1 }
 0x155   :  { %v314_v60 = vpop.permute.xlu0 %313 }
 0x156   :  { %3112 = vmatpush3.xpose.msk.msra.mxu1 %vm315_vm2, %v314_v60 }
 0x157   :  { %3116 = vmatprep.subr.mxu1 %v3449_v7 }
 0x159   :  { %3114 = vmatmul.mubr.msk.f32.vlgmr.msra.gmra.mrb[10].mxu1 %vm315_vm2, %v150_v62 }
 0x15a   :  { %3117 = vmatpush3.msra.mxu1 %v3622_v61  ;;  %3118 = vmatprep.mubr.msk.f32.mxu1 %vm3450_vm1, %v3449_v7 }
 0x15b   :  { %3121 = vmatprep.subr.mxu1 %v3449_v7 }
 0x22c   :  { %v387_v63 = vpop.f32.mrb[10].mxu1 }
 0x22d   :  { %v391_v0 = vmul.f32 0.125, %v387_v63  ;;  %v3115_v1 = vpop.f32.mrb[11].mxu1 }
 0x22f   :  { %v393_v2 = vsel %vm392_vm3, %v391_v0, -inf }
 0x230   :  { %394 = vmax.xlane.f32.xlu0 %v393_v2 }
 0x246   :  { %1147 = vrot.lane.b32.xlu0 %v233_v3, %s3451_s23 }
 0x2bd   :  { %v395_v4 = vpop.xlane.xlu0 %394 }
 0x2be   :  { %v396_v5 = vsub.f32 %v391_v0, %v395_v4 }
 0x2c0   :  { %v397_v6 = vmul.f32 1.442695, %v396_v5 }
 0x2c1   :  { %v1148_v21 = vpop.permute.xlu0 %1147 }
 0x2c2   :  { %3369 = vpow2.f32 %v397_v6  ;;  %v304_v6 = vadd.f32 %v3616_v57, %v3609_v53 }
 0x2cc   :  { %v3370_v8 = vpop.eup %3369 }
 0x2cd   :  { %v399_v9 = vsel %vm392_vm3, %v3370_v8, 0.0 }
 0x2ce   :  { %400 = vadd.xlane.f32.xlu1 %v399_v9 }
 0x2df   :  { %478 = vrot.lane.b32.xlu1 %v150_v62, %s3451_s23 }
 0x2e3   :  { %650 = vrot.lane.b32.xlu1 %v227_v47, %s3451_s23 }
 0x2e7   :  { %813 = vrot.lane.b32.xlu1 %v158_v10, %s3451_s23 }
 0x2eb   :  { %976 = vrot.lane.b32.xlu1 %v156_v11, %s3451_s23 }
 0x35b   :  { %v401_v12 = vpop.xlane.xlu1 %400 }
 0x35c   :  { %3371 = vrcp.f32 %v401_v12 }
 0x35f   :  { %v479_v14 = vpop.permute.xlu1 %478 }
 0x363   :  { %v651_v17 = vpop.permute.xlu1 %650 }
 0x366   :  { %v3372_v15 = vpop.eup %3371 }
 0x367   :  { %v403_v16 = vmul.f32 %v3372_v15, %v3370_v8  ;;  %v814_v18 = vpop.permute.xlu1 %813 }
 0x369   :  { %3119 = vmatmul.mubr.msk.f32.vlgmr.msra.gmra.mrb[12].mxu1 %vm392_vm3, %v403_v16 }
 0x36a   :  { %3122 = vmatpush3.xpose.msk.msra.mxu1 %vm315_vm2, %v227_v47  ;;  %3123 = vmatprep.mubr.msk.f32.mxu1 %vm3450_vm1, %v3449_v7 }
 0x36b   :  { %3131 = vmatprep.subr.mxu1 %v3449_v7  ;;  %v977_v20 = vpop.permute.xlu1 %976 }
 0x36d   :  { %3124 = vmatmul.mubr.msk.f32.vlgmr.msra.gmra.mrb[14].mxu1 %vm315_vm2, %v479_v14 }
 0x36e   :  { %3132 = vmatpush3.xpose.msk.msra.mxu1 %vm315_vm2, %v651_v17  ;;  %3133 = vmatprep.mubr.msk.f32.mxu1 %vm3450_vm1, %v3449_v7 }
 0x36f   :  { %3141 = vmatprep.subr.mxu1 %v3449_v7 }
 0x371   :  { %3134 = vmatmul.mubr.msk.f32.vlgmr.msra.gmra.mrb[16].mxu1 %vm315_vm2, %v3596_v40 }
 0x372   :  { %3142 = vmatpush3.xpose.msk.msra.mxu1 %vm315_vm2, %v814_v18  ;;  %3143 = vmatprep.mubr.msk.f32.mxu1 %vm3450_vm1, %v3449_v7 }
 0x373   :  { %3151 = vmatprep.subr.mxu1 %v3449_v7 }
 0x375   :  { %3144 = vmatmul.mubr.msk.f32.vlgmr.msra.gmra.mrb[18].mxu1 %vm315_vm2, %v156_v11 }
 0x376   :  { %3152 = vmatpush3.xpose.msk.msra.mxu1 %vm315_vm2, %v233_v3  ;;  %3153 = vmatprep.mubr.msk.f32.mxu1 %vm3450_vm1, %v3449_v7 }
 0x377   :  { %3161 = vmatprep.subr.mxu1 %v3449_v7 }
 0x379   :  { %3154 = vmatmul.mubr.msk.f32.vlgmr.msra.gmra.mrb[20].mxu1 %vm315_vm2, %v977_v20 }
 0x37a   :  { %3162 = vmatpush3.xpose.msk.msra.mxu1 %vm315_vm2, %v1148_v21  ;;  %3163 = vmatprep.mubr.msk.f32.mxu1 %vm3450_vm1, %v3449_v7 }
 0x37d   :  { %3164 = vmatmul.mubr.msk.f32.vlgmr.msra.gmra.mrb[22].mxu1 %vm315_vm2, %v158_v10 }
 0x43c   :  { %v473_v22 = vpop.f32.mrb[12].mxu1 }
 0x43d   :  { %477 = vst.msk [vmem:[#allocation2] sm:$0xff] %vm315_vm2, %v473_v22  ;;  %v3120_v23 = vpop.f32.mrb[13].mxu1 }
 0x440   :  { %v551_v24 = vpop.f32.mrb[14].mxu1 }
 0x441   :  { %v555_v25 = vmul.f32 0.125, %v551_v24  ;;  %v3125_v26 = vpop.f32.mrb[15].mxu1  ;;  %v1313_v24 = vld [vmem:[%s4143_s3] sm:$0xff] }
 0x442   :  { %v3452_v26 = vmov 0.0|0.0  }
 0x443   :  { %v556_v27 = vsel %vm392_vm3, %v555_v25, -inf  ;;  %3266 = vmatprep.subr.bf16.mxu1 %v3452_v26 }
 0x444   :  { %557 = vmax.xlane.f32.xlu1 %v556_v27  ;;  %v722_v28 = vpop.f32.mrb[16].mxu1 }
 0x445   :  { %v726_v29 = vmul.f32 0.125, %v722_v28  ;;  %v3135_v30 = vpop.f32.mrb[17].mxu1  ;;  %v1316_v28 = vld [vmem:[%s4143_s3 + $0x18] sm:$0xff] }
 0x446   :  { %v1317_v30 = vld [vmem:[%s4143_s3 + $0x20] sm:$0xff] }
 0x447   :  { %v727_v31 = vsel %vm392_vm3, %v726_v29, -inf }
 0x448   :  { %728 = vmax.xlane.f32.xlu0 %v727_v31  ;;  %v886_v32 = vpop.f32.mrb[18].mxu1  ;;  %v1318_v31 = vld [vmem:[%s4143_s3 + $0x28] sm:$0xff] }
 0x449   :  { %v3145_v33 = vpop.f32.mrb[19].mxu1  ;;  %v890_v63 = vmul.f32 0.125, %v886_v32  ;;  %v3273_v32 = vpack.c.bf16 %v1318_v31, %v1317_v30  ;;  %v2958_v31 = vld [vmem:[%s4144_s4] ss:$0 sm:$0xff] }
 0x44a   :  { %v1319_v33 = vld [vmem:[%s4143_s3 + $0x30] sm:$0xff] }
 0x44b   :  { %v891_v0 = vsel %vm392_vm3, %v890_v63, -inf }
 0x44c   :  { %v1049_v36 = vpop.f32.mrb[20].mxu1 }
 0x44d   :  { %v3155_v37 = vpop.f32.mrb[21].mxu1  ;;  %v1053_v52 = vmul.f32 0.125, %v1049_v36  ;;  %v1320_v36 = vld [vmem:[%s4143_s3 + $0x38] sm:$0xff] }
 0x44e   :  { %v3276_v37 = vpack.c.bf16 %v1320_v36, %v1319_v33 }
 0x44f   :  { %v1054_v60 = vsel %vm392_vm3, %v1053_v52, -inf }
 0x450   :  { %v1219_v38 = vpop.f32.mrb[22].mxu1 }
 0x451   :  { %v3165_v39 = vpop.f32.mrb[23].mxu1  ;;  %v1223_v59 = vmul.f32 0.125, %v1219_v38  ;;  %v1321_v38 = vld [vmem:[%s4143_s3 + $0x40] sm:$0xff] }
 0x452   :  { %v1322_v39 = vld [vmem:[%s4143_s3 + $0x48] sm:$0xff] }
 0x453   :  { %v1224_v62 = vsel %vm392_vm3, %v1223_v59, -inf }
 0x4d1   :  { %v558_v40 = vpop.xlane.xlu1 %557 }
 0x4d2   :  { %v559_v41 = vsub.f32 %v555_v25, %v558_v40  ;;  %v1314_v25 = vld [vmem:[%s4143_s3 + $0x8] sm:$0xff]  ;;  %v3279_v40 = vpack.c.bf16 %v1322_v39, %v1321_v38 }
 0x4d3   :  { %v3267_v27 = vpack.c.bf16 %v1314_v25, %v1313_v24 }
 0x4d4   :  { %v560_v42 = vmul.f32 1.442695, %v559_v41  ;;  %v1323_v41 = vld [vmem:[%s4143_s3 + $0x50] sm:$0xff] }
 0x4d5   :  { %v729_v44 = vpop.xlane.xlu0 %728  ;;  %3268 = vmatpush1.bf16.msra.mxu1 %v3267_v27 }
 0x4d6   :  { %3373 = vpow2.f32 %v560_v42  ;;  %v730_v45 = vsub.f32 %v726_v29, %v729_v44  ;;  %3269 = vmatprep.subr.bf16.mxu1 %v3452_v26  ;;  %v1324_v42 = vld [vmem:[%s4143_s3 + $0x58] sm:$0xff] }
 0x4d7   :  { %v3282_v44 = vpack.c.bf16 %v1324_v42, %v1323_v41 }
 0x4d8   :  { %v731_v47 = vmul.f32 1.442695, %v730_v45  ;;  %v1325_v45 = vld [vmem:[%s4143_s3 + $0x60] sm:$0xff] }
 0x4da   :  { %3375 = vpow2.f32 %v731_v47  ;;  %v1326_v47 = vld [vmem:[%s4143_s3 + $0x68] sm:$0xff] }
 0x4e0   :  { %v3374_v48 = vpop.eup %3373 }
 0x4e1   :  { %v562_v50 = vsel %vm392_vm3, %v3374_v48, 0.0 }
 0x4e2   :  { %563 = vadd.xlane.f32.xlu1 %v562_v50  ;;  %v1327_v50 = vld [vmem:[%s4143_s3 + $0x70] sm:$0xff] }
 0x4e4   :  { %v3376_v51 = vpop.eup %3375 }
 0x4e5   :  { %v733_v55 = vsel %vm392_vm3, %v3376_v51, 0.0 }
 0x4e6   :  { %734 = vadd.xlane.f32.xlu0 %v733_v55  ;;  %v1329_v55 = vld [vmem:[%s4143_s3 + $0x80] sm:$0xff] }
 0x4ea   :  { %1055 = vmax.xlane.f32.xlu0 %v1054_v60 }
 0x4ee   :  { %1225 = vmax.xlane.f32.xlu0 %v1224_v62  ;;  %v1331_v62 = vld [vmem:[%s4143_s3 + $0x90] sm:$0xff] }
 0x4f3   :  { %568 = vrot.lane.b32.xlu1 %v3622_v61, %s3451_s23 }
 0x517   :  { %892 = vmax.xlane.f32.xlu1 %v891_v0 }
 0x56f   :  { %v564_v1 = vpop.xlane.xlu1 %563 }
 0x570   :  { %3377 = vrcp.f32 %v564_v1 }
 0x573   :  { %v569_v2 = vpop.permute.xlu1 %568  ;;  %v735_v3 = vpop.xlane.xlu0 %734 }
 0x574   :  { %3379 = vrcp.f32 %v735_v3  ;;  %3127 = vmatpush3.msra.mxu0 %v569_v2  ;;  %v1333_v2 = vld [vmem:[%s4143_s3 + $0xa0] sm:$0xff]  ;;  %v1334_v3 = vld [vmem:[%s4143_s3 + $0xa8] sm:$0xff] }
 0x575   :  { %3136 = vmatprep.subr.mxu0 %v3449_v7 }
 0x577   :  { %v1056_v53 = vpop.xlane.xlu0 %1055 }
 0x578   :  { %v1057_v57 = vsub.f32 %v1053_v52, %v1056_v53 }
 0x57a   :  { %v3378_v4 = vpop.eup %3377  ;;  %v1058_v11 = vmul.f32 1.442695, %v1057_v57 }
 0x57b   :  { %v566_v5 = vmul.f32 %v3378_v4, %v3374_v48  ;;  %v1226_v18 = vpop.xlane.xlu0 %1225  ;;  %v3285_v48 = vpack.c.bf16 %v1326_v47, %v1325_v45  ;;  %v3297_v4 = vpack.c.bf16 %v1334_v3, %v1333_v2  ;;  %v2964_v47 = vld [vmem:[%s4141_s1 + $0xa8] sm:$0xff]  ;;  %v2979_v2 = vld [vmem:[%s4141_s1 + $0x120] sm:$0xff] }
 0x57c   :  { %v1227_v20 = vsub.f32 %v1223_v59, %v1226_v18  ;;  %v1330_v59 = vld [vmem:[%s4143_s3 + $0x88] sm:$0xff] }
 0x57d   :  { %3129 = vmatmul.mubr.msk.f32.vlgmr.msra.gmra.mrb[0].mxu0 %vm392_vm3, %v566_v5  ;;  %v3291_v60 = vpack.c.bf16 %v1330_v59, %v1329_v55  ;;  %v1335_v5 = vld [vmem:[%s4143_s3 + $0xb0] sm:$0xff]  ;;  %v2968_v55 = vld [vmem:[%s4141_s1 + $0xc8] sm:$0xff] }
 0x57e   :  { %v3380_v61 = vpop.eup %3379  ;;  %3137 = vmatpush3.msra.mxu0 %v304_v6  ;;  %3138 = vmatprep.mubr.msk.f32.mxu0 %vm3450_vm1, %v3449_v7  ;;  %v1228_v21 = vmul.f32 1.442695, %v1227_v20  ;;  %v1336_v6 = vld [vmem:[%s4143_s3 + $0xb8] sm:$0xff]  ;;  %v2976_v3 = vld [vmem:[%s4141_s1 + $0x108] sm:$0xff] }
 0x57f   :  { %v737_v8 = vmul.f32 %v3380_v61, %v3376_v51  ;;  %3146 = vmatprep.subr.mxu0 %v3449_v7  ;;  %v1328_v51 = vld [vmem:[%s4143_s3 + $0x78] sm:$0xff] }
 0x580   :  { %v3288_v52 = vpack.c.bf16 %v1328_v51, %v1327_v50  ;;  %v2971_v51 = vld [vmem:[%s4141_s1 + $0xe0] sm:$0xff] }
 0x581   :  { %3139 = vmatmul.mubr.msk.f32.vlgmr.msra.gmra.mrb[2].mxu0 %vm392_vm3, %v737_v8  ;;  %v3300_v8 = vpack.c.bf16 %v1336_v6, %v1335_v5  ;;  %v2981_v5 = vld [vmem:[%s4141_s1 + $0x130] sm:$0xff] }
 0x582   :  { %3147 = vmatpush3.msra.mxu0 %v3611_v54  ;;  %3148 = vmatprep.mubr.msk.f32.mxu0 %vm3450_vm1, %v3449_v7  ;;  %v2973_v6 = vld [vmem:[%s4141_s1 + $0xf0] sm:$0xff] }
 0x583   :  { %3156 = vmatprep.subr.mxu0 %v3449_v7 }
 0x5a4   :  { %v893_v9 = vpop.xlane.xlu1 %892 }
 0x5a5   :  { %v894_v10 = vsub.f32 %v890_v63, %v893_v9  ;;  %v1332_v63 = vld [vmem:[%s4143_s3 + $0x98] sm:$0xff] }
 0x5a6   :  { %v3294_v0 = vpack.c.bf16 %v1332_v63, %v1331_v62  ;;  %v2965_v62 = vld [vmem:[%s4141_s1 + $0xb0] sm:$0xff]  ;;  %v2970_v63 = vld [vmem:[%s4141_s1 + $0xd8] sm:$0xff] }
 0x5a7   :  { %v895_v12 = vmul.f32 1.442695, %v894_v10 }
 0x5a9   :  { %3381 = vpow2.f32 %v895_v12 }
 0x5aa   :  { %3383 = vpow2.f32 %v1058_v11 }
 0x5ab   :  { %3385 = vpow2.f32 %v1228_v21 }
 0x5b3   :  { %v3685_v14 = vpop.eup %3381 }
 0x5b4   :  { %v897_v15 = vsel %vm392_vm3, %v3685_v14, 0.0  ;;  %v3689_v16 = vpop.eup %3383 }
 0x5b5   :  { %898 = vadd.xlane.f32.xlu0 %v897_v15  ;;  %v1060_v17 = vsel %vm392_vm3, %v3689_v16, 0.0  ;;  %v3695_v22 = vpop.eup %3385 }
 0x5b6   :  { %v1230_v23 = vsel %vm392_vm3, %v3695_v22, 0.0 }
 0x5b9   :  { %1061 = vadd.xlane.f32.xlu0 %v1060_v17 }
 0x5cf   :  { %1066 = vrot.lane.b32.xlu0 %v3611_v54, %s3451_s23  ;;  %v1315_v54 = vld [vmem:[%s4143_s3 + $0x10] sm:$0xff] }
 0x5d0   :  { %v3270_v29 = vpack.c.bf16 %v1316_v28, %v1315_v54 }
 0x5d2   :  { %3271 = vmatpush1.bf16.msra.mxu1 %v3270_v29 }
 0x5d3   :  { %3272 = vmatprep.subr.bf16.mxu1 %v3452_v26 }
 0x5d6   :  { %3274 = vmatpush1.bf16.msra.mxu1 %v3273_v32 }
 0x5d7   :  { %3275 = vmatprep.subr.bf16.mxu1 %v3452_v26 }
 0x5da   :  { %3277 = vmatpush1.bf16.msra.mxu1 %v3276_v37 }
 0x5db   :  { %3278 = vmatprep.subr.bf16.mxu1 %v3452_v26 }
 0x5de   :  { %3280 = vmatpush1.bf16.msra.mxu1 %v3279_v40 }
 0x5df   :  { %3281 = vmatprep.subr.bf16.mxu1 %v3452_v26 }
 0x5e2   :  { %3283 = vmatpush1.bf16.msra.mxu1 %v3282_v44 }
 0x5e3   :  { %3284 = vmatprep.subr.bf16.mxu1 %v3452_v26 }
 0x5e6   :  { %3286 = vmatpush1.bf16.msra.mxu1 %v3285_v48  ;;  %v2966_v48 = vld [vmem:[%s4141_s1 + $0xb8] sm:$0xff] }
 0x5e7   :  { %3287 = vmatprep.subr.bf16.mxu1 %v3452_v26  ;;  %v3310_v59 = vpack.c.bf16 %v2971_v51, %v2966_v48 }
 0x5ea   :  { %3289 = vmatpush1.bf16.msra.mxu1 %v3288_v52  ;;  %v2963_v52 = vld [vmem:[%s4141_s1 + $0xa0] sm:$0xff] }
 0x5eb   :  { %3290 = vmatprep.subr.bf16.mxu1 %v3452_v26 }
 0x5ee   :  { %1231 = vadd.xlane.f32.xlu0 %v1230_v23  ;;  %3292 = vmatpush1.bf16.msra.mxu1 %v3291_v60  ;;  %v3304_v60 = vpack.c.bf16 %v2968_v55, %v2963_v52 }
 0x5ef   :  { %3293 = vmatprep.subr.bf16.mxu1 %v3452_v26 }
 0x5f2   :  { %3295 = vmatpush1.bf16.msra.mxu1 %v3294_v0  ;;  %v3312_v0 = vpack.c.bf16 %v2970_v63, %v2965_v62 }
 0x5f3   :  { %3296 = vmatprep.subr.bf16.mxu1 %v3452_v26 }
 0x5f6   :  { %3298 = vmatpush1.bf16.msra.mxu1 %v3297_v4 }
 0x5f7   :  { %3299 = vmatprep.subr.bf16.mxu1 %v3452_v26 }
 0x5fa   :  { %3301 = vmatpush1.bf16.msra.mxu1 %v3300_v8  ;;  %v3314_v8 = vpack.c.bf16 %v2981_v5, %v2976_v3 }
 0x642   :  { %v899_v1 = vpop.xlane.xlu0 %898 }
 0x643   :  { %3387 = vrcp.f32 %v899_v1  ;;  %v2974_v1 = vld [vmem:[%s4141_s1 + $0xf8] sm:$0xff] }
 0x644   :  { %v3306_v4 = vpack.c.bf16 %v2979_v2, %v2974_v1 }
 0x646   :  { %v1062_v61 = vpop.xlane.xlu0 %1061 }
 0x647   :  { %3389 = vrcp.f32 %v1062_v61  ;;  %v2978_v61 = vld [vmem:[%s4141_s1 + $0x118] sm:$0xff] }
 0x64a   :  { %v1067_v9 = vpop.permute.xlu0 %1066 }
 0x64d   :  { %v3388_v53 = vpop.eup %3387 }
 0x64e   :  { %v901_v57 = vmul.f32 %v3388_v53, %v3685_v14  ;;  %v3308_v53 = vpack.c.bf16 %v2978_v61, %v2973_v6 }
 0x650   :  { %v640_v10 = vpop.f32.mrb[0].mxu0  ;;  %3149 = vmatmul.mubr.msk.f32.vlgmr.msra.gmra.mrb[4].mxu0 %vm392_vm3, %v901_v57  ;;  %v2975_v57 = vld [vmem:[%s4141_s1 + $0x100] sm:$0xff] }
 0x651   :  { %v3390_v11 = vpop.eup %3389  ;;  %3157 = vmatpush3.msra.mxu0 %v1067_v9  ;;  %v3130_v12 = vpop.f32.mrb[1].mxu0  ;;  %645 = vrot.lane.b32.xlu1 %v640_v10, %s3451_s23  ;;  %v2980_v9 = vld [vmem:[%s4141_s1 + $0x128] sm:$0xff] }
 0x652   :  { %v1064_v15 = vmul.f32 %v3390_v11, %v3689_v16  ;;  %3158 = vmatprep.mubr.msk.f32.mxu0 %vm3450_vm1, %v3449_v7  ;;  %3166 = vmatprep.subr.mxu0 %v3449_v7  ;;  %v3316_v10 = vpack.c.bf16 %v2980_v9, %v2975_v57 }
 0x654   :  { %v807_v17 = vpop.f32.mrb[2].mxu0  ;;  %3159 = vmatmul.mubr.msk.f32.vlgmr.msra.gmra.mrb[6].mxu0 %vm392_vm3, %v1064_v15 }
 0x655   :  { %811 = vst.msk [vmem:[#allocation2 + $0x8] sm:$0xff] %vm315_vm2, %v807_v17  ;;  %3167 = vmatpush3.msra.mxu0 %v3614_v56  ;;  %v3140_v14 = vpop.f32.mrb[3].mxu0  ;;  %3168 = vmatprep.mubr.msk.f32.mxu0 %vm3450_vm1, %v3449_v7 }
 0x656   :  { %3311 = vmatprep.subr.bf16.mxu0 %v3310_v59 }
 0x65c   :  { %v1310_v18 = vld [vmem:[#allocation2 + $0x8] sm:$0xff] }
 0x65d   :  { %2959 = vmatprep.mubr.msk.f32.mxu1 %vm315_vm2, %v1310_v18 }
 0x67b   :  { %v1232_v16 = vpop.xlane.xlu0 %1231 }
 0x67c   :  { %3391 = vrcp.f32 %v1232_v16 }
 0x686   :  { %v3392_v20 = vpop.eup %3391 }
 0x687   :  { %v1234_v21 = vmul.f32 %v3392_v20, %v3695_v22 }
 0x689   :  { %3169 = vmatmul.mubr.msk.f32.vlgmr.msra.gmra.mrb[8].mxu0 %vm392_vm3, %v1234_v21 }
 0x68a   :  { %1668 = vmatprep.mubr.f32.mxu0 %v3449_v7  ;;  %3313 = vmatpush1.bf16.msra.mxu0 %v3312_v0 }
 0x68b   :  { %3315 = vmatprep.subr.bf16.mxu0 %v3314_v8 }
 0x68e   :  { %3317 = vmatpush1.bf16.msra.mxu0 %v3316_v10 }
 0x6c3   :  { %v646_v23 = vpop.permute.xlu1 %645 }
 0x6c4   :  { %649 = vst.msk [vmem:[#allocation2] sm:$0xff] %vm648_vm4, %v646_v23  ;;  %v2961_v23 = vld [vmem:[%s4145_s5] ss:$0 sm:$0xff] }
 0x6cb   :  { %v1309_v56 = vld [vmem:[#allocation2] sm:$0xff] }
 0x6cc   :  { %1415 = vmatmul.mubr.f32.vlgmr.msra.gmra.mrb[24].mxu1 %v1309_v56 }
 0x723   :  { %v971_v24 = vpop.f32.mrb[4].mxu0 }
 0x724   :  { %975 = vst.msk [vmem:[#allocation2 + $0x10] sm:$0xff] %vm315_vm2, %v971_v24  ;;  %v3150_v25 = vpop.f32.mrb[5].mxu0  ;;  %v2962_v24 = vld [vmem:[%s4146_s6] ss:$0 sm:$0xff] }
 0x727   :  { %v1138_v54 = vpop.f32.mrb[6].mxu0 }
 0x728   :  { %1143 = vrot.lane.b32.xlu1 %v1138_v54, %s3451_s23  ;;  %v3160_v27 = vpop.f32.mrb[7].mxu0 }
 0x75c   :  { %v1304_v28 = vpop.f32.mrb[8].mxu0 }
 0x75d   :  { %1308 = vst.msk [vmem:[#allocation2 + $0x18] sm:$0xff] %vm315_vm2, %v1304_v28  ;;  %v3170_v22 = vpop.f32.mrb[9].mxu0 }
 0x764   :  { %v1312_v29 = vld [vmem:[#allocation2 + $0x18] sm:$0xff] }
 0x765   :  { %2960 = vmatprep.mubr.msk.f32.mxu1 %vm315_vm2, %v1312_v29 }
 0x79a   :  { %v1144_v30 = vpop.permute.xlu1 %1143 }
 0x79b   :  { %1146 = vst.msk [vmem:[#allocation2 + $0x10] sm:$0xff] %vm648_vm4, %v1144_v30  ;;  %v2967_v30 = vld [vmem:[%s4141_s1 + $0xc0] sm:$0xff] }
 0x79f   :  { %v1416_v32 = vpop.f32.mrb[24].mxu1 }
 0x7a0   :  { %v1417_v33 = vadd.f32 %v2958_v31, %v1416_v32  ;;  %v1418_v36 = vpop.f32.mrb[25].mxu1 }
 0x7a1   :  { %v2982_v36 = vld [vmem:[%s4141_s1 + $0x138] sm:$0xff] }
 0x7a2   :  { %v1311_v37 = vld [vmem:[#allocation2 + $0x10] sm:$0xff]  ;;  %v1425_v38 = vadd.f32 %v1417_v33, %v3525_v13 }
 0x7a3   :  { %1420 = vmatmul.mubr.f32.gmra.mrb[26].mxu1 %v1311_v37  ;;  %v2969_v13 = vld [vmem:[%s4141_s1 + $0xd0] sm:$0xff] }
 0x7a4   :  { %v1427_v39 = vsel %vm76_vm0, %v1425_v38, 0.0  ;;  %1591 = vmatprep.mubr.f32.mxu1 %v3449_v7  ;;  %v3302_v50 = vpack.c.bf16 %v2969_v13, %v2964_v47  ;;  %v2977_v33 = vld [vmem:[%s4141_s1 + $0x110] sm:$0xff] }
 0x7a5   :  { %1428 = vadd.xlane.f32.xlu1 %v1427_v39  ;;  %v3322_v37 = vpack.c.bf16 %v2982_v36, %v2977_v33 }
 0x7a6   :  { %3303 = vmatprep.subr.bf16.mxu1 %v3302_v50 }
 0x7a7   :  { %3305 = vmatpush1.bf16.msra.mxu1 %v3304_v60 }
 0x7a8   :  { %3307 = vmatprep.subr.bf16.mxu1 %v3306_v4 }
 0x7ab   :  { %3309 = vmatpush1.bf16.msra.mxu1 %v3308_v53 }
 0x7ac   :  { %3217 = vmatprep.subr.mxu1 %v3449_v7 }
 0x832   :  { %v1429_v40 = vpop.xlane.xlu1 %1428 }
 0x833   :  { %v1434_v41 = vmul.f32 0.03125, %v1429_v40 }
 0x835   :  { %v1436_v42 = vsub.f32 %v1425_v38, %v1434_v41  ;;  %v2983_v41 = vld [vmem:[%s4142_s2 + $0x5] sm:$0x1f]  ;;  %s3453_s2 = smov [#allocation3]  }
 0x836   :  { %v1511_v59 = vrot.slane %v2983_v41, %v65_v46  ;;  %v1515_v2 = vrot.slane %v2983_v41, %v69_v49  ;;  %s2923_s28 = sshll.u32 %s3453_s2, 4  ;;  %s2924_s28 = int_to_ptr.vmem [resolvable:$true] %s2923_s28 }
 0x837   :  { %v1438_v44 = vmul.f32 %v1436_v42, %v1436_v42  ;;  %p3430_p1 = scmp.lt.s32.totalorder %s2924_s28, %s2924_s28 }
 0x839   :  { %v1440_v45 = vsel %vm76_vm0, %v1438_v44, 0.0  ;;  %v3896_v44 = vrot.slane %v2983_v41, %v57_v35  ;;  %v3919_v35 = vrot.slane %v2983_v41, %v53_v58 }
 0x83a   :  { %1441 = vadd.xlane.f32.xlu0 %v1440_v45 }
 0x876   :  { %v1421_v11 = vpop.f32.mrb[26].mxu1 }
 0x877   :  { %v1422_v12 = vadd.f32 %v2958_v31, %v1421_v11  ;;  %v1423_v15 = vpop.f32.mrb[27].mxu1  ;;  %v2972_v31 = vld [vmem:[%s4141_s1 + $0xe8] sm:$0xff] }
 0x878   :  { %v3318_v32 = vpack.c.bf16 %v2972_v31, %v2967_v30 }
 0x879   :  { %v1426_v17 = vadd.f32 %v1422_v12, %v3545_v19 }
 0x87a   :  { %3319 = vmatprep.subr.bf16.mxu0 %v3318_v32 }
 0x87b   :  { %v1430_v14 = vsel %vm76_vm0, %v1426_v17, 0.0 }
 0x87c   :  { %1431 = vadd.xlane.f32.xlu0 %v1430_v14 }
 0x8c7   :  { %v1442_v18 = vpop.xlane.xlu0 %1441 }
 0x8c8   :  { %v1446_v16 = vmul.f32 0.03125, %v1442_v18 }
 0x8ca   :  { %v1448_v20 = vadd.f32 1e-05, %v1446_v16 }
 0x8cc   :  { %3393 = vrsqrt.f32 %v1448_v20 }
 0x8d6   :  { %v3394_v21 = vpop.eup %3393 }
 0x8d7   :  { %v1452_v56 = vmul.f32 %v3394_v21, %v1436_v42 }
 0x8d9   :  { %v1461_v25 = vmul.f32 %v2961_v23, %v1452_v56 }
 0x8db   :  { %v3869_v54 = vadd.f32 %v2962_v24, %v1461_v25 }
 0x8dd   :  { %2984 = vmatmul.mubr.msk.f32.vlgmr.msra.gmra.mrb[28].mxu1 %vm76_vm0, %v3869_v54  ;;  %2986 = vmatmul.mubr.msk.f32.vlgmr.msra.gmra.mrb[10].mxu0 %vm76_vm0, %v3869_v54 }
 0x8de   :  { %1597 = vmatprep.mubr.f32.mxu1 %v3449_v7  ;;  %1674 = vmatprep.mubr.f32.mxu0 %v3449_v7 }
 0x8df   :  { %3321 = vmatpush3.bf16.msra.mxu0 %v3318_v32 }
 0x8e0   :  { %3323 = vmatprep.subr.bf16.mxu0 %v3322_v37 }
 0x8e3   :  { %3325 = vmatpush3.bf16.msra.mxu0 %v3322_v37 }
 0x8e4   :  { %3182 = vmatprep.subr.mxu0 %v3449_v7 }
 0x909   :  { %v1432_v19 = vpop.xlane.xlu0 %1431 }
 0x90a   :  { %v1435_v27 = vmul.f32 0.03125, %v1432_v19 }
 0x90c   :  { %v1437_v28 = vsub.f32 %v1426_v17, %v1435_v27  ;;  %v1507_v17 = vrot.slane %v2983_v41, %v61_v43 }
 0x90e   :  { %v1439_v22 = vmul.f32 %v1437_v28, %v1437_v28 }
 0x910   :  { %v1443_v29 = vsel %vm76_vm0, %v1439_v22, 0.0 }
 0x911   :  { %1444 = vadd.xlane.f32.xlu0 %v1443_v29 }
 0x99e   :  { %v1445_v38 = vpop.xlane.xlu0 %1444 }
 0x99f   :  { %v1447_v39 = vmul.f32 0.03125, %v1445_v38 }
 0x9a1   :  { %v1449_v40 = vadd.f32 1e-05, %v1447_v39 }
 0x9a3   :  { %3395 = vrsqrt.f32 %v1449_v40 }
 0x9ad   :  { %v3396_v42 = vpop.eup %3395 }
 0x9ae   :  { %v1453_v45 = vmul.f32 %v3396_v42, %v1437_v28 }
 0x9b0   :  { %v1593_v47 = vpop.f32.mrb[28].mxu1  ;;  %v1670_v13 = vpop.f32.mrb[10].mxu0  ;;  %v1462_v48 = vmul.f32 %v2961_v23, %v1453_v45 }
 0x9b1   :  { %v1595_v50 = vpop.f32.mrb[29].mxu1  ;;  %v1672_v51 = vpop.f32.mrb[11].mxu0  ;;  %v1594_v62 = vadd.f32 %v1593_v47, %v3919_v35  ;;  %v1671_v16 = vadd.f32 %v1670_v13, %v1507_v17 }
 0x9b2   :  { %v3899_v52 = vadd.f32 %v1595_v50, %v3896_v44  ;;  %v3901_v55 = vadd.f32 %v2962_v24, %v1462_v48  ;;  %v1673_v63 = vadd.f32 %v1672_v51, %v1511_v59 }
 0x9b4   :  { %1757 = vrot.lane.b32.xlu0 %v3899_v52, %s3451_s23  ;;  %2985 = vmatmul.mubr.msk.f32.gmra.mrb[30].mxu1 %vm76_vm0, %v3901_v55 }
 0x9b5   :  { %2987 = vmatmul.mubr.msk.f32.gmra.mrb[12].mxu0 %vm76_vm0, %v3901_v55  ;;  %3219 = vmatprep.mubr.msk.f32.mxu1 %vm3450_vm1, %v3449_v7 }
 0x9b6   :  { %3179 = vmatprep.mubr.msk.f32.mxu0 %vm76_vm0, %v3869_v54 }
 0x9b9   :  { %3180 = vmatmul.mubr.msk.f32.vlgmr.msra.gmra.mrb[14].mxu0 %vm76_vm0, %v3901_v55 }
 0x9ba   :  { %3184 = vmatprep.mubr.msk.f32.mxu0 %vm3450_vm1, %v3449_v7 }
 0xa26   :  { %v1758_v60 = vpop.permute.xlu0 %1757 }
 0xa27   :  { %3183 = vmatpush3.xpose.msk.msra.mxu0 %vm315_vm2, %v1758_v60 }
 0xa28   :  { %3187 = vmatprep.subr.mxu0 %v3449_v7 }
 0xa2a   :  { %3185 = vmatmul.mubr.msk.f32.vlgmr.msra.gmra.mrb[16].mxu0 %vm315_vm2, %v1594_v62 }
 0xa2b   :  { %3188 = vmatpush3.msra.mxu0 %v1673_v63  ;;  %3189 = vmatprep.mubr.msk.f32.mxu0 %vm3450_vm1, %v3449_v7 }
 0xa2c   :  { %3192 = vmatprep.subr.mxu0 %v3449_v7 }
 0xa87   :  { %v3930_v58 = vpop.f32.mrb[30].mxu1 }
 0xa88   :  { %v3932_v0 = vpop.f32.mrb[12].mxu0  ;;  %v3934_v46 = vpop.f32.mrb[31].mxu1 }
 0xa89   :  { %v1678_v1 = vpop.f32.mrb[13].mxu0  ;;  %v1602_v45 = vadd.f32 %v3934_v46, %v3896_v44  ;;  %v1677_v47 = vadd.f32 %v3932_v0, %v1507_v17  ;;  %v3009_v17 = vld [vmem:[%s4143_s3 + $0xc8] sm:$0xff] }
 0xa8a   :  { %v3938_v3 = vadd.f32 %v1678_v1, %v1511_v59  ;;  %v1600_v59 = vadd.f32 %v3930_v58, %v3919_v35 }
 0xa8c   :  { %v3181_v4 = vpop.f32.mrb[14].mxu0  ;;  %3218 = vmatpush3.msra.mxu1 %v3938_v3 }
 0xa8d   :  { %v3941_v5 = vadd.f32 %v3181_v4, %v1515_v2  ;;  %v1747_v6 = vpop.f32.mrb[15].mxu0  ;;  %3227 = vmatprep.subr.mxu1 %v3449_v7 }
 0xa8e   :  { %v1748_v36 = vadd.f32 %v1747_v6, %v1515_v2 }
 0xafd   :  { %v1830_v61 = vpop.f32.mrb[16].mxu0 }
 0xafe   :  { %v1834_v8 = vmul.f32 0.125, %v1830_v61  ;;  %v3186_v53 = vpop.f32.mrb[17].mxu0 }
 0xb00   :  { %v1835_v57 = vsel %vm392_vm3, %v1834_v8, -inf }
 0xb01   :  { %1836 = vmax.xlane.f32.xlu1 %v1835_v57 }
 0xb8e   :  { %v1837_v9 = vpop.xlane.xlu1 %1836 }
 0xb8f   :  { %v1838_v10 = vsub.f32 %v1834_v8, %v1837_v9 }
 0xb91   :  { %v1839_v11 = vmul.f32 1.442695, %v1838_v10 }
 0xb93   :  { %3397 = vpow2.f32 %v1839_v11 }
 0xb9d   :  { %v3398_v49 = vpop.eup %3397 }
 0xb9e   :  { %v1841_v12 = vsel %vm392_vm3, %v3398_v49, 0.0 }
 0xb9f   :  { %1842 = vadd.xlane.f32.xlu1 %v1841_v12 }
 0xbb0   :  { %1920 = vrot.lane.b32.xlu1 %v1594_v62, %s3451_s23 }
 0xc2c   :  { %v1843_v15 = vpop.xlane.xlu1 %1842 }
 0xc2d   :  { %3399 = vrcp.f32 %v1843_v15  ;;  %v3008_v15 = vld [vmem:[%s4143_s3 + $0xc0] sm:$0xff] }
 0xc30   :  { %v1921_v20 = vpop.permute.xlu1 %1920 }
 0xc37   :  { %v3400_v14 = vpop.eup %3399 }
 0xc38   :  { %v1845_v18 = vmul.f32 %v3400_v14, %v3398_v49  ;;  %v3010_v14 = vld [vmem:[%s4143_s3 + $0xd0] sm:$0xff] }
 0xc3a   :  { %3190 = vmatmul.mubr.msk.f32.vlgmr.msra.gmra.mrb[18].mxu0 %vm392_vm3, %v1845_v18  ;;  %v3327_v18 = vpack.c.bf16 %v3009_v17, %v3008_v15 }
 0xc3b   :  { %3193 = vmatpush3.xpose.msk.msra.mxu0 %vm315_vm2, %v1671_v16  ;;  %3194 = vmatprep.mubr.msk.f32.mxu0 %vm3450_vm1, %v3449_v7 }
 0xc3c   :  { %3197 = vmatprep.subr.mxu0 %v3449_v7 }
 0xc3e   :  { %3195 = vmatmul.mubr.msk.f32.vlgmr.msra.gmra.mrb[20].mxu0 %vm315_vm2, %v1921_v20 }
 0xc3f   :  { %3199 = vmatprep.mubr.msk.f32.mxu0 %vm3450_vm1, %v3449_v7 }
 0xd0d   :  { %v1915_v34 = vpop.f32.mrb[18].mxu0 }
 0xd0e   :  { %1919 = vst.msk [vmem:[#allocation2] sm:$0xff] %vm315_vm2, %v1915_v34  ;;  %v3191_v43 = vpop.f32.mrb[19].mxu0  ;;  %v3012_v34 = vld [vmem:[%s4143_s3 + $0xe0] sm:$0xff] }
 0xd0f   :  { %v3013_v43 = vld [vmem:[%s4143_s3 + $0xe8] sm:$0xff] }
 0xd11   :  { %v1993_v21 = vpop.f32.mrb[20].mxu0 }
 0xd12   :  { %v1997_v23 = vmul.f32 0.125, %v1993_v21  ;;  %v3196_v56 = vpop.f32.mrb[21].mxu0  ;;  %v3333_v21 = vpack.c.bf16 %v3013_v43, %v3012_v34 }
 0xd13   :  { %v3015_v56 = vld [vmem:[%s4143_s3 + $0xf8] sm:$0xff] }
 0xd14   :  { %v1998_v24 = vsel %vm392_vm3, %v1997_v23, -inf }
 0xd15   :  { %1999 = vmax.xlane.f32.xlu0 %v1998_v24 }
 0xd2b   :  { %2010 = vrot.lane.b32.xlu0 %v1673_v63, %s3451_s23 }
 0xda2   :  { %v2000_v25 = vpop.xlane.xlu0 %1999 }
 0xda3   :  { %v2001_v19 = vsub.f32 %v1997_v23, %v2000_v25  ;;  %v3014_v23 = vld [vmem:[%s4143_s3 + $0xf0] sm:$0xff]  ;;  %v3016_v25 = vld [vmem:[%s4143_s3 + $0x100] sm:$0xff] }
 0xda4   :  { %v3336_v24 = vpack.c.bf16 %v3015_v56, %v3014_v23 }
 0xda5   :  { %v2002_v27 = vmul.f32 1.442695, %v2001_v19  ;;  %v3017_v19 = vld [vmem:[%s4143_s3 + $0x108] sm:$0xff] }
 0xda6   :  { %v2011_v28 = vpop.permute.xlu0 %2010 }
 0xda7   :  { %3401 = vpow2.f32 %v2002_v27  ;;  %3198 = vmatpush3.msra.mxu0 %v2011_v28  ;;  %v3339_v27 = vpack.c.bf16 %v3017_v19, %v3016_v25  ;;  %v3018_v28 = vld [vmem:[%s4143_s3 + $0x110] sm:$0xff] }
 0xda8   :  { %3202 = vmatprep.subr.mxu0 %v3449_v7 }
 0xdb1   :  { %v3402_v22 = vpop.eup %3401 }
 0xdb2   :  { %v2004_v29 = vsel %vm392_vm3, %v3402_v22, 0.0 }
 0xdb3   :  { %2005 = vadd.xlane.f32.xlu1 %v2004_v29 }
 0xdc4   :  { %2091 = vrot.lane.b32.xlu1 %v1671_v16, %s3451_s23  ;;  %v3011_v16 = vld [vmem:[%s4143_s3 + $0xd8] sm:$0xff] }
 0xdc5   :  { %v3330_v20 = vpack.c.bf16 %v3011_v16, %v3010_v14 }
 0xe40   :  { %v2006_v30 = vpop.xlane.xlu1 %2005 }
 0xe41   :  { %3403 = vrcp.f32 %v2006_v30  ;;  %v3020_v30 = vld [vmem:[%s4143_s3 + $0x120] sm:$0xff] }
 0xe44   :  { %v2092_v33 = vpop.permute.xlu1 %2091 }
 0xe4b   :  { %v3404_v31 = vpop.eup %3403 }
 0xe4c   :  { %v2008_v32 = vmul.f32 %v3404_v31, %v3402_v22  ;;  %v3019_v22 = vld [vmem:[%s4143_s3 + $0x118] sm:$0xff]  ;;  %v3021_v31 = vld [vmem:[%s4143_s3 + $0x128] sm:$0xff] }
 0xe4d   :  { %v3342_v29 = vpack.c.bf16 %v3019_v22, %v3018_v28 }
 0xe4e   :  { %3200 = vmatmul.mubr.msk.f32.vlgmr.msra.gmra.mrb[22].mxu0 %vm392_vm3, %v2008_v32  ;;  %v3345_v32 = vpack.c.bf16 %v3021_v31, %v3020_v30 }
 0xe4f   :  { %3203 = vmatpush3.xpose.msk.msra.mxu0 %vm315_vm2, %v2092_v33  ;;  %3204 = vmatprep.mubr.msk.f32.mxu0 %vm3450_vm1, %v3449_v7 }
 0xe50   :  { %3207 = vmatprep.subr.mxu0 %v3449_v7 }
 0xe52   :  { %3205 = vmatmul.mubr.msk.f32.vlgmr.msra.gmra.mrb[24].mxu0 %vm315_vm2, %v3899_v52 }
 0xe53   :  { %3208 = vmatpush3.msra.mxu0 %v1748_v36  ;;  %3209 = vmatprep.mubr.msk.f32.mxu0 %vm3450_vm1, %v3449_v7 }
 0xe54   :  { %3212 = vmatprep.subr.mxu0 %v3449_v7 }
 0xf21   :  { %v3973_v37 = vpop.f32.mrb[22].mxu0 }
 0xf22   :  { %v3201_v38 = vpop.f32.mrb[23].mxu0 }
 0xf25   :  { %v2163_v39 = vpop.f32.mrb[24].mxu0 }
 0xf26   :  { %v2167_v40 = vmul.f32 0.125, %v2163_v39  ;;  %v3206_v41 = vpop.f32.mrb[25].mxu0 }
 0xf28   :  { %v2168_v42 = vsel %vm392_vm3, %v2167_v40, -inf }
 0xf29   :  { %2169 = vmax.xlane.f32.xlu0 %v2168_v42 }
 0xf3f   :  { %2254 = vrot.lane.b32.xlu0 %v1602_v45, %s3451_s23 }
 0xf43   :  { %2588 = vrot.lane.b32.xlu0 %v1677_v47, %s3451_s23 }
 0xfb6   :  { %v2170_v13 = vpop.xlane.xlu0 %2169 }
 0xfb7   :  { %v2171_v48 = vsub.f32 %v2167_v40, %v2170_v13 }
 0xfb9   :  { %v2172_v50 = vmul.f32 1.442695, %v2171_v48 }
 0xfba   :  { %v2255_v63 = vpop.permute.xlu0 %2254 }
 0xfbb   :  { %3405 = vpow2.f32 %v2172_v50 }
 0xfbe   :  { %v2589_v58 = vpop.permute.xlu0 %2588 }
 0xfc5   :  { %v3406_v51 = vpop.eup %3405 }
 0xfc6   :  { %v2174_v52 = vsel %vm392_vm3, %v3406_v51, 0.0 }
 0xfc7   :  { %2175 = vadd.xlane.f32.xlu1 %v2174_v52 }
 0xfd8   :  { %2417 = vrot.lane.b32.xlu1 %v1600_v59, %s3451_s23 }
0x1054   :  { %v2176_v44 = vpop.xlane.xlu1 %2175 }
0x1055   :  { %3407 = vrcp.f32 %v2176_v44  ;;  %v3022_v44 = vld [vmem:[%s4143_s3 + $0x130] sm:$0xff] }
0x1058   :  { %v2418_v35 = vpop.permute.xlu1 %2417 }
0x105f   :  { %v3408_v60 = vpop.eup %3407 }
0x1060   :  { %v2178_v62 = vmul.f32 %v3408_v60, %v3406_v51  ;;  %v3023_v60 = vld [vmem:[%s4143_s3 + $0x138] sm:$0xff] }
0x1062   :  { %3210 = vmatmul.mubr.msk.f32.vlgmr.msra.gmra.mrb[26].mxu0 %vm392_vm3, %v2178_v62  ;;  %v3348_v62 = vpack.c.bf16 %v3023_v60, %v3022_v44 }
0x1063   :  { %3213 = vmatpush3.xpose.msk.msra.mxu0 %vm315_vm2, %v2255_v63  ;;  %3214 = vmatprep.mubr.msk.f32.mxu0 %vm3450_vm1, %v3449_v7  ;;  %v3024_v63 = vld [vmem:[%s4143_s3 + $0x140] sm:$0xff] }
0x1064   :  { %3222 = vmatprep.subr.mxu0 %v3449_v7 }
0x1066   :  { %3215 = vmatmul.mubr.msk.f32.vlgmr.msra.gmra.mrb[28].mxu0 %vm315_vm2, %v1600_v59 }
0x1067   :  { %3223 = vmatpush3.xpose.msk.msra.mxu0 %vm315_vm2, %v1677_v47  ;;  %3224 = vmatprep.mubr.msk.f32.mxu0 %vm3450_vm1, %v3449_v7 }
0x1068   :  { %3232 = vmatprep.subr.mxu0 %v3449_v7 }
0x106a   :  { %3225 = vmatmul.mubr.msk.f32.vlgmr.msra.gmra.mrb[30].mxu0 %vm315_vm2, %v2418_v35  ;;  %v3025_v35 = vld [vmem:[%s4143_s3 + $0x148] sm:$0xff] }
0x106b   :  { %3233 = vmatpush3.xpose.msk.msra.mxu0 %vm315_vm2, %v2589_v58  ;;  %3234 = vmatprep.mubr.msk.f32.mxu0 %vm3450_vm1, %v3449_v7  ;;  %v3351_v58 = vpack.c.bf16 %v3025_v35, %v3024_v63 }
0x106c   :  { %3326 = vmatprep.subr.bf16.mxu0 %v3452_v26 }
0x106e   :  { %3235 = vmatmul.mubr.msk.f32.vlgmr.msra.gmra.mrb[32].mxu0 %vm315_vm2, %v1602_v45 }
0x106f   :  { %3328 = vmatpush1.bf16.msra.mxu0 %v3327_v18 }
0x1070   :  { %3329 = vmatprep.subr.bf16.mxu0 %v3452_v26 }
0x1073   :  { %3331 = vmatpush1.bf16.msra.mxu0 %v3330_v20 }
0x1074   :  { %3332 = vmatprep.subr.bf16.mxu0 %v3452_v26 }
0x1077   :  { %3334 = vmatpush1.bf16.msra.mxu0 %v3333_v21 }
0x1078   :  { %3335 = vmatprep.subr.bf16.mxu0 %v3452_v26 }
0x107b   :  { %3337 = vmatpush1.bf16.msra.mxu0 %v3336_v24 }
0x107c   :  { %3338 = vmatprep.subr.bf16.mxu0 %v3452_v26 }
0x107f   :  { %3340 = vmatpush1.bf16.msra.mxu0 %v3339_v27 }
0x1080   :  { %3341 = vmatprep.subr.bf16.mxu0 %v3452_v26 }
0x1083   :  { %3343 = vmatpush1.bf16.msra.mxu0 %v3342_v29 }
0x1084   :  { %3344 = vmatprep.subr.bf16.mxu0 %v3452_v26 }
0x1087   :  { %3346 = vmatpush1.bf16.msra.mxu0 %v3345_v32 }
0x1088   :  { %3347 = vmatprep.subr.bf16.mxu0 %v3452_v26 }
0x108b   :  { %3349 = vmatpush1.bf16.msra.mxu0 %v3348_v62 }
0x108c   :  { %3350 = vmatprep.subr.bf16.mxu0 %v3452_v26 }
0x108f   :  { %3352 = vmatpush1.bf16.msra.mxu0 %v3351_v58 }
0x1090   :  { %3353 = vmatprep.subr.bf16.mxu0 %v3452_v26 }
0x1135   :  { %v2248_v0 = vpop.f32.mrb[26].mxu0 }
0x1136   :  { %2252 = vst.msk [vmem:[#allocation2 + $0x8] sm:$0xff] %vm315_vm2, %v2248_v0  ;;  %v3211_v46 = vpop.f32.mrb[27].mxu0  ;;  %v3026_v0 = vld [vmem:[%s4143_s3 + $0x150] sm:$0xff] }
0x1137   :  { %v3027_v46 = vld [vmem:[%s4143_s3 + $0x158] sm:$0xff] }
0x1139   :  { %v2327_v1 = vpop.f32.mrb[28].mxu0 }
0x113a   :  { %v2331_v2 = vmul.f32 0.125, %v2327_v1  ;;  %v3216_v4 = vpop.f32.mrb[29].mxu0  ;;  %v3354_v1 = vpack.c.bf16 %v3027_v46, %v3026_v0 }
0x113b   :  { %v3029_v4 = vld [vmem:[%s4143_s3 + $0x168] sm:$0xff] }
0x113c   :  { %v2332_v6 = vsel %vm392_vm3, %v2331_v2, -inf  ;;  %3355 = vmatpush1.bf16.msra.mxu0 %v3354_v1 }
0x113d   :  { %2333 = vmax.xlane.f32.xlu0 %v2332_v6  ;;  %v2490_v61 = vpop.f32.mrb[30].mxu0  ;;  %v2751_v8 = vld [vmem:[#allocation2 + $0x8] sm:$0xff]  ;;  %3356 = vmatprep.subr.bf16.mxu0 %v3452_v26 }
0x113e   :  { %v2494_v53 = vmul.f32 0.125, %v2490_v61  ;;  %v3226_v57 = vpop.f32.mrb[31].mxu0  ;;  %3034 = vmatprep.mubr.msk.f32.mxu0 %vm315_vm2, %v2751_v8  ;;  %v3031_v61 = vld [vmem:[%s4143_s3 + $0x178] sm:$0xff] }
0x1140   :  { %v2495_v9 = vsel %vm392_vm3, %v2494_v53, -inf }
0x1141   :  { %2496 = vmax.xlane.f32.xlu1 %v2495_v9  ;;  %v2660_v10 = vpop.f32.mrb[32].mxu0 }
0x1142   :  { %v2664_v11 = vmul.f32 0.125, %v2660_v10  ;;  %v3236_v49 = vpop.f32.mrb[33].mxu0 }
0x1144   :  { %v2665_v12 = vsel %vm392_vm3, %v2664_v11, -inf }
0x1145   :  { %2666 = vmax.xlane.f32.xlu0 %v2665_v12 }
0x11ca   :  { %v2334_v33 = vpop.xlane.xlu0 %2333 }
0x11cb   :  { %v2335_v36 = vsub.f32 %v2331_v2, %v2334_v33  ;;  %v3028_v2 = vld [vmem:[%s4143_s3 + $0x160] sm:$0xff] }
0x11cc   :  { %v3357_v6 = vpack.c.bf16 %v3029_v4, %v3028_v2 }
0x11cd   :  { %v2336_v38 = vmul.f32 1.442695, %v2335_v36 }
0x11ce   :  { %v2497_v39 = vpop.xlane.xlu1 %2496  ;;  %3358 = vmatpush1.bf16.msra.mxu0 %v3357_v6 }
0x11cf   :  { %3409 = vpow2.f32 %v2336_v38  ;;  %v2498_v40 = vsub.f32 %v2494_v53, %v2497_v39  ;;  %3359 = vmatprep.subr.bf16.mxu0 %v3452_v26 }
0x11d1   :  { %v2499_v41 = vmul.f32 1.442695, %v2498_v40 }
0x11d2   :  { %v2667_v42 = vpop.xlane.xlu0 %2666 }
0x11d3   :  { %3411 = vpow2.f32 %v2499_v41  ;;  %v2668_v45 = vsub.f32 %v2664_v11, %v2667_v42 }
0x11d5   :  { %v2669_v47 = vmul.f32 1.442695, %v2668_v45 }
0x11d7   :  { %3413 = vpow2.f32 %v2669_v47 }
0x11d9   :  { %v3410_v13 = vpop.eup %3409 }
0x11da   :  { %v2338_v48 = vsel %vm392_vm3, %v3410_v13, 0.0 }
0x11db   :  { %2339 = vadd.xlane.f32.xlu0 %v2338_v48 }
0x11dd   :  { %v3412_v50 = vpop.eup %3411 }
0x11de   :  { %v2501_v51 = vsel %vm392_vm3, %v3412_v50, 0.0 }
0x11df   :  { %2502 = vadd.xlane.f32.xlu0 %v2501_v51 }
0x11e1   :  { %v3414_v52 = vpop.eup %3413 }
0x11e2   :  { %v2671_v59 = vsel %vm392_vm3, %v3414_v52, 0.0 }
0x11e3   :  { %2672 = vadd.xlane.f32.xlu1 %v2671_v59  ;;  %v3039_v59 = vld [vmem:[%s4146_s6 + $0x1] ss:$0 sm:$0xff] }
0x11f4   :  { %2087 = vrot.lane.b32.xlu1 %v3973_v37, %s3451_s23  ;;  %v3030_v37 = vld [vmem:[%s4143_s3 + $0x170] sm:$0xff] }
0x11f5   :  { %2507 = vrot.lane.b32.xlu0 %v3938_v3, %s3451_s23  ;;  %v3360_v8 = vpack.c.bf16 %v3031_v61, %v3030_v37 }
0x11f7   :  { %3361 = vmatpush1.bf16.msra.mxu0 %v3360_v8 }
0x1268   :  { %v2340_v53 = vpop.xlane.xlu0 %2339 }
0x1269   :  { %3415 = vrcp.f32 %v2340_v53 }
0x126c   :  { %v2503_v57 = vpop.xlane.xlu0 %2502 }
0x126d   :  { %3417 = vrcp.f32 %v2503_v57 }
0x1270   :  { %v2673_v9 = vpop.xlane.xlu1 %2672  ;;  %v2508_v26 = vpop.permute.xlu0 %2507 }
0x1271   :  { %3419 = vrcp.f32 %v2673_v9 }
0x1273   :  { %v3416_v3 = vpop.eup %3415 }
0x1274   :  { %v2342_v10 = vmul.f32 %v3416_v3, %v3410_v13  ;;  %v2088_v11 = vpop.permute.xlu1 %2087 }
0x1275   :  { %2090 = vst.msk [vmem:[#allocation2] sm:$0xff] %vm648_vm4, %v2088_v11 }
0x1276   :  { %3220 = vmatmul.mubr.msk.f32.vlgmr.msra.gmra.mrb[32].mxu1 %vm392_vm3, %v2342_v10 }
0x1277   :  { %v3418_v49 = vpop.eup %3417  ;;  %3228 = vmatpush3.msra.mxu1 %v2508_v26  ;;  %3229 = vmatprep.mubr.msk.f32.mxu1 %vm3450_vm1, %v3449_v7 }
0x1278   :  { %v2505_v12 = vmul.f32 %v3418_v49, %v3412_v50  ;;  %3237 = vmatprep.subr.mxu1 %v3449_v7 }
0x127a   :  { %3230 = vmatmul.mubr.msk.f32.vlgmr.msra.gmra.mrb[34].mxu1 %vm392_vm3, %v2505_v12 }
0x127b   :  { %v3420_v15 = vpop.eup %3419  ;;  %3238 = vmatpush3.msra.mxu1 %v3941_v5  ;;  %3239 = vmatprep.mubr.msk.f32.mxu1 %vm3450_vm1, %v3449_v7  ;;  %v3033_v5 = vld [vmem:[%s4144_s4 + $0x1] ss:$0 sm:$0xff] }
0x127c   :  { %v2675_v17 = vmul.f32 %v3420_v15, %v3414_v52  ;;  %v2750_v14 = vld [vmem:[#allocation2] sm:$0xff] }
0x127d   :  { %2858 = vmatmul.mubr.f32.vlgmr.msra.gmra.mrb[34].mxu0 %v2750_v14 }
0x127e   :  { %3240 = vmatmul.mubr.msk.f32.vlgmr.msra.gmra.mrb[36].mxu1 %vm392_vm3, %v2675_v17 }
0x1349   :  { %v2412_v18 = vpop.f32.mrb[32].mxu1 }
0x134a   :  { %2416 = vst.msk [vmem:[#allocation2 + $0x10] sm:$0xff] %vm315_vm2, %v2412_v18  ;;  %v3221_v16 = vpop.f32.mrb[33].mxu1 }
0x134d   :  { %v2579_v20 = vpop.f32.mrb[34].mxu1 }
0x134e   :  { %2584 = vrot.lane.b32.xlu0 %v2579_v20, %s3451_s23  ;;  %v3231_v34 = vpop.f32.mrb[35].mxu1 }
0x1350   :  { %v2859_v43 = vpop.f32.mrb[34].mxu0 }
0x1351   :  { %v2860_v21 = vadd.f32 %v3033_v5, %v2859_v43  ;;  %v2745_v7 = vpop.f32.mrb[36].mxu1  ;;  %v2861_v23 = vpop.f32.mrb[35].mxu0 }
0x1352   :  { %2749 = vst.msk [vmem:[#allocation2 + $0x18] sm:$0xff] %vm315_vm2, %v2745_v7  ;;  %v3241_v56 = vpop.f32.mrb[37].mxu1 }
0x1353   :  { %v2868_v24 = vadd.f32 %v2860_v21, %v3869_v54 }
0x1355   :  { %v2870_v25 = vsel %vm76_vm0, %v2868_v24, 0.0 }
0x1356   :  { %2871 = vadd.xlane.f32.xlu1 %v2870_v25 }
0x1359   :  { %v2753_v19 = vld [vmem:[#allocation2 + $0x18] sm:$0xff] }
0x135a   :  { %3035 = vmatprep.mubr.msk.f32.mxu0 %vm315_vm2, %v2753_v19 }
0x13c0   :  { %v2585_v27 = vpop.permute.xlu0 %2584 }
0x13c1   :  { %2587 = vst.msk [vmem:[#allocation2 + $0x10] sm:$0xff] %vm648_vm4, %v2585_v27 }
0x13c8   :  { %v2752_v28 = vld [vmem:[#allocation2 + $0x10] sm:$0xff] }
0x13c9   :  { %2863 = vmatmul.mubr.f32.gmra.mrb[36].mxu0 %v2752_v28 }
0x13e3   :  { %v2872_v22 = vpop.xlane.xlu1 %2871 }
0x13e4   :  { %v2876_v29 = vmul.f32 0.03125, %v2872_v22 }
0x13e6   :  { %v2878_v31 = vsub.f32 %v2868_v24, %v2876_v29 }
0x13e8   :  { %v2880_v38 = vmul.f32 %v2878_v31, %v2878_v31 }
0x13ea   :  { %v2882_v39 = vsel %vm76_vm0, %v2880_v38, 0.0 }
0x149c   :  { %v2864_v30 = vpop.f32.mrb[36].mxu0 }
0x149d   :  { %v2865_v32 = vadd.f32 %v3033_v5, %v2864_v30  ;;  %v2866_v33 = vpop.f32.mrb[37].mxu0 }
0x149f   :  { %v2869_v36 = vadd.f32 %v2865_v32, %v3901_v55  ;;  %v3037_v55 = vld [vmem:[%s4145_s5 + $0x1] ss:$0 sm:$0xff]  ;;  %s3425_s5 = scalar_lea.vmem %s2924_s28, 256 }
0x14a0   :  { %p3426_p0 = scmp.ne.s32.totalorder %s2924_s28, %s3425_s5  ;;  %p3431_p2 = scmp.lt.s32.totalorder %s3425_s5, %s3425_s5 }
0x14a1   :  { %v2873_v54 = vsel %vm76_vm0, %v2869_v36, 0.0 }
0x14a2   :  { %2874 = vadd.xlane.f32.xlu0 %v2873_v54  ;;  %p3432_p3 = por %p3431_p2, %p3430_p1 }
0x14a4   :  { %p3433_p4 = pnand %p3432_p3, %p3426_p0 }
0x14a6   :  { %2883 = vadd.xlane.f32.xlu0 %v2882_v39 }
0x152f   :  { %v2875_v40 = vpop.xlane.xlu0 %2874 }
0x1530   :  { %v2877_v41 = vmul.f32 0.03125, %v2875_v40 }
0x1532   :  { %v2879_v42 = vsub.f32 %v2869_v36, %v2877_v41 }
0x1533   :  { %v2884_v45 = vpop.xlane.xlu0 %2883 }
0x1534   :  { %v2888_v47 = vmul.f32 0.03125, %v2884_v45  ;;  %v2881_v13 = vmul.f32 %v2879_v42, %v2879_v42 }
0x1536   :  { %v2890_v48 = vadd.f32 1e-05, %v2888_v47  ;;  %v2885_v50 = vsel %vm76_vm0, %v2881_v13, 0.0 }
0x1537   :  { %2886 = vadd.xlane.f32.xlu1 %v2885_v50 }
0x1538   :  { %3421 = vrsqrt.f32 %v2890_v48 }
0x1542   :  { %v3422_v51 = vpop.eup %3421 }
0x1543   :  { %v2894_v52 = vmul.f32 %v3422_v51, %v2878_v31 }
0x1545   :  { %v2904_v44 = vmul.f32 %v3037_v55, %v2894_v52 }
0x1547   :  { %v2914_v60 = vadd.f32 %v3039_v59, %v2904_v44 }
0x1549   :  { %2916 = vst.msk [vmem:[#allocation3] sm:$0xff] %vm76_vm0, %v2914_v60 }
0x15c4   :  { %v2887_v62 = vpop.xlane.xlu1 %2886 }
0x15c5   :  { %v2889_v63 = vmul.f32 0.03125, %v2887_v62 }
0x15c7   :  { %v2891_v35 = vadd.f32 1e-05, %v2889_v63 }
0x15c9   :  { %3423 = vrsqrt.f32 %v2891_v35 }
0x15d3   :  { %v3424_v58 = vpop.eup %3423 }
0x15d4   :  { %v2895_v0 = vmul.f32 %v3424_v58, %v2879_v42 }
0x15d6   :  { %v2905_v46 = vmul.f32 %v3037_v55, %v2895_v0 }
0x15d8   :  { %v2915_v1 = vadd.f32 %v3039_v59, %v2905_v46 }
0x15da   :  { %2917 = vst.msk [vmem:[#allocation3 + $0x8] sm:$0xff] %vm76_vm0, %v2915_v1 }
0x15db   :  { %3436 = shalt.err (!%p3433_p4)
}
0x15dc   :  { %s3437_s30 = scalar_lea.hbm %s4147_s7, 256 }
0x15dd   :  { %p3438_p5 = scmp.ne.s32.totalorder %s4147_s7, %s3437_s30  ;;  %p3441_p6 = scmp.lt.u32.totalorder %s3437_s30, %s4147_s7 }
0x15df   :  { %p3443_p7 = pnand %p3441_p6, %p3438_p5 }
0x15e1   :  { %3446 = shalt.err (!%p3443_p7)
}
0x15e2   :  { %s3454_s12 = smov 128   ;;  %s3455_s13 = smov 8  }
0x15e3   :  { %2929 = dma.vmem_to_hbm [thread:$0]  %s2924_s28, 256, %s4147_s7, [#allocation4], %s3454_s12, %s3454_s12, %s3455_s13  }
0x15e4   :  { %3447 = dma.done.wait [#allocation4], 256  }
0x15e5   :  { %3448 = vsyncadd [#allocation4], 4294967040 }
0x15e6   :  { %2933 = vsyncpa [#allocation4], 1 }

</bundles_post_ra>
